<compile_context>
chip_gen: v6e
topology: v6e:2x2x1
jax: 0.10.0
libtpu: 0.0.40
codegen_flags: <defaults>
</compile_context>

<pallas_src>
import functools
import numpy as np
import jax
import jax.numpy as jnp
from jax.experimental import pallas as pl
from jax.experimental.pallas import tpu as pltpu

# ---------------- config (small synthetic sizes consistent with the module) ----------------
VOCAB = 20
WORD_DIM = 16                     # word embedding dim (dw)
POS_DIM = 4                       # pos_dim
POS_LEN = 10
POS_VOCAB = 2 * POS_LEN + 3
HIDDEN = 32                       # hidden_size
REL_NUM = 5
N_SENT = 6                        # number of sentences in the batch
SEQ_LEN = 16                      # multiple of 8 -> in-kernel [N,L,C] <-> [N*L,C] reshapes are layout no-ops
LAMBDA_PCNN = 0.05
LAMBDA_SAN = 1.0
D_P = WORD_DIM + 2 * POS_DIM      # pos-aware embedding dim (24)
D_E = 3 * WORD_DIM                # entity-aware embedding dim (48)
D_A = 3 * WORD_DIM                # SAN attention hidden dim (48)
CLS_PAD = 128                     # classifier output padded to a full 128-lane vector

# ---- weight-slab row layout (bf16 slab, 128 lanes wide; all row starts multiples of 16) ----
ROW_GATE = 0                      # [D_E, 4*D_P] = [48, 96]  : [pcnn_we | pcnn_wx | san_we | san_wx]
ROW_CONV = 48                     # [D_P, 3*HIDDEN] = [24, 96]: kernel-3 taps, tap-major columns
ROW_ATTN1 = 80                    # [D_P, D_A] = [24, 48]
ROW_ATTN2 = 112                   # [D_A, 1]  = [48, 1]
ROW_FC1 = 160                     # [D_E, D_E] = [48, 48]
ROW_FC2 = 208                     # [D_E, 3*HIDDEN] = [48, 96]
ROW_CLS = 256                     # [3*HIDDEN, CLS_PAD] = [96, 128]
W_SLAB_ROWS = 352


def _mxu(a, w):
    """MXU matmul: bf16 operands, f32 accumulation. astype is a no-op for already-bf16 weights."""
    return jnp.dot(a.astype(jnp.bfloat16), w.astype(jnp.bfloat16),
                   preferred_element_type=jnp.float32)


# ---------------- single fused Pallas kernel ----------------

def _seg_fused_kernel(xp_ref, xe_ref, mask_ref, scope_ref, w_ref, b_ref, out_ref,
                      *, n, L, dp, de, hid, da, lam_pcnn, lam_san):
    nl = n * L

    xp = xp_ref[...].reshape(nl, dp)                  # [NL, D_P]  pos-aware embedding
    xe3 = xe_ref[...]                                 # [N, L, D_E] entity-aware embedding
    xe = xe3.reshape(nl, de)                          # [NL, D_E]

    # ---- static slab slices (row starts tile-aligned) ----
    w_gate = w_ref[ROW_GATE:ROW_GATE + de, 0:4 * dp]          # [48, 96] bf16
    w_conv = w_ref[ROW_CONV:ROW_CONV + dp, 0:3 * hid]         # [24, 96]
    w_attn1 = w_ref[ROW_ATTN1:ROW_ATTN1 + dp, 0:da]           # [24, 48]
    w_attn2 = w_ref[ROW_ATTN2:ROW_ATTN2 + da, 0:1]            # [48, 1]
    w_fc1 = w_ref[ROW_FC1:ROW_FC1 + de, 0:de]                 # [48, 48]
    w_fc2 = w_ref[ROW_FC2:ROW_FC2 + de, 0:3 * hid]            # [48, 96]
    w_cls = w_ref[ROW_CLS:ROW_CLS + 3 * hid, :]               # [96, 128]

    b = b_ref[...]                                            # [8, 128] f32
    b_gate = b[0:1, 0:4 * dp]
    b_conv = b[1:2, 0:hid]
    b_at1 = b[2:3, 0:da]
    b_fc1 = b[3:4, 0:de]
    b_fc2 = b[4:5, 0:3 * hid]
    b_cls = b[5:6, :]

    # ---- fused entity-aware gates (PCNN + SAN branches): ONE lane-dense matmul ----
    # columns: [ we_p | wx_p | we_s | wx_s ], each D_P wide
    gate = _mxu(xe, w_gate) + b_gate                          # [NL, 4*D_P]
    a_p = jax.nn.sigmoid(lam_pcnn * gate[:, 0:dp])
    xf_p = a_p * xp + (1.0 - a_p) * gate[:, dp:2 * dp]        # [NL, D_P]
    a_s = jax.nn.sigmoid(lam_san * gate[:, 2 * dp:3 * dp])
    xf_s = a_s * xp + (1.0 - a_s) * gate[:, 3 * dp:4 * dp]    # [NL, D_P]

    # ---- PCNN: kernel-3 conv (zero pad=1) as ONE matmul + XLU rolls ----
    # y = xf_p @ [W_prev | W_cur | W_next]; h[r] = y_prev[r-1] + y_cur[r] + y_next[r+1] + b
    y = _mxu(xf_p, w_conv)                                    # [NL, 3H]
    pos = jax.lax.broadcasted_iota(jnp.int32, (n, L, 1), 1).reshape(nl, 1)   # position within sentence
    h = (jnp.where(pos == 0, 0.0, pltpu.roll(y[:, 0:hid], shift=1, axis=0))
         + y[:, hid:2 * hid]
         + jnp.where(pos == L - 1, 0.0, pltpu.roll(y[:, 2 * hid:3 * hid], shift=nl - 1, axis=0))
         + b_conv)                                            # [NL, H]
    h3 = h.reshape(n, L, hid)

    # piecewise max pooling over the 3 mask segments (mask: 1/2/3, 0 = pad), then ReLU
    m = mask_ref[...][:, :, None]                             # [N, L, 1] int32 (lane-dense DMA)
    neg = jnp.float32(-1e30)
    pieces = [jnp.max(jnp.where(m == (j + 1), h3, neg), axis=1) for j in range(3)]  # 3 x [N, H]
    s_feat = jax.nn.relu(jnp.concatenate(pieces, axis=-1))    # [N, 3H], piece-major

    # ---- SAN branch ----
    hid_a = jnp.tanh(_mxu(xf_s, w_attn1) + b_at1)             # [NL, D_A]
    scores = _mxu(hid_a, w_attn2).reshape(n, L, 1)            # [N, L, 1]
    smax = jnp.max(scores, axis=1, keepdims=True)
    sexp = jnp.exp(scores - smax)
    alpha = sexp * pl.reciprocal(jnp.sum(sexp, axis=1, keepdims=True), approx=True)
    u = jnp.sum(alpha * xe3, axis=1)                          # [N, D_E]

    # ---- selective gate + bag mean + classifier ----
    # G = sigmoid(fc2(tanh(fc1(U)))); X = G*S; B = scope_mean @ X; logits = B @ Wc + bc
    g = jax.nn.sigmoid(_mxu(jnp.tanh(_mxu(u, w_fc1) + b_fc1), w_fc2) + b_fc2)   # [N, 3H]
    x_gated = g * s_feat                                      # [N, 3H]
    bag = _mxu(scope_ref[...], x_gated)                       # [8, 3H] (rows >= num_bags are zero)
    out_ref[...] = _mxu(bag, w_cls) + b_cls                   # [8, 128] lane/sublane-dense store


# ---------------- parameter init (deterministic, synthetic) ----------------

def xavier_uniform(key, shape):
    a = float(np.sqrt(6.0 / (shape[0] + shape[1])))
    return jax.random.uniform(key, shape, jnp.float32, -a, a)


def init_params(key):
    ks = jax.random.split(key, 16)
    p = {}
    p["word_emb"] = 0.1 * jax.random.normal(ks[0], (VOCAB, WORD_DIM), jnp.float32)
    p["pos1_emb"] = 0.1 * jax.random.normal(ks[1], (POS_VOCAB, POS_DIM), jnp.float32)
    p["pos2_emb"] = 0.1 * jax.random.normal(ks[2], (POS_VOCAB, POS_DIM), jnp.float32)
    # PCNN entity-aware fusion
    p["pcnn_we"] = xavier_uniform(ks[3], (D_E, D_P)); p["pcnn_be"] = jnp.zeros((D_P,), jnp.float32)
    p["pcnn_wx"] = xavier_uniform(ks[4], (D_E, D_P)); p["pcnn_bx"] = jnp.zeros((D_P,), jnp.float32)
    # SAN entity-aware fusion
    p["san_we"] = xavier_uniform(ks[5], (D_E, D_P));  p["san_be"] = jnp.zeros((D_P,), jnp.float32)
    p["san_wx"] = xavier_uniform(ks[6], (D_E, D_P));  p["san_bx"] = jnp.zeros((D_P,), jnp.float32)
    # PCNN conv: kernel-3 taps stored tap-major along columns: [D_P, 3*H] = [W_prev | W_cur | W_next]
    p["conv_w"] = xavier_uniform(ks[7], (D_P, 3 * HIDDEN))
    p["conv_b"] = jnp.zeros((HIDDEN,), jnp.float32)
    # SAN attention (w2 stored as [D_A, 1] so scores are a matmul)
    p["attn_w1"] = xavier_uniform(ks[8], (D_P, D_A)); p["attn_b1"] = jnp.zeros((D_A,), jnp.float32)
    p["attn_w2"] = xavier_uniform(ks[9], (D_A, 1))
    # selective gate + classifier (exactly as in SeG.__init__)
    p["fc1_w"] = xavier_uniform(ks[10], (D_E, D_E));            p["fc1_b"] = jnp.zeros((D_E,), jnp.float32)
    p["fc2_w"] = xavier_uniform(ks[11], (D_E, 3 * HIDDEN));     p["fc2_b"] = jnp.zeros((3 * HIDDEN,), jnp.float32)
    p["cls_w"] = xavier_uniform(ks[12], (3 * HIDDEN, REL_NUM)); p["cls_b"] = jnp.zeros((REL_NUM,), jnp.float32)
    return p


def build_slabs(params):
    """Pack all weights into one bf16 [352,128] slab and all biases into one f32 [8,128] slab."""
    w = jnp.zeros((W_SLAB_ROWS, 128), jnp.float32)
    w = w.at[ROW_GATE:ROW_GATE + D_E, 0:4 * D_P].set(
        jnp.concatenate([params["pcnn_we"], params["pcnn_wx"],
                         params["san_we"], params["san_wx"]], axis=1))
    w = w.at[ROW_CONV:ROW_CONV + D_P, 0:3 * HIDDEN].set(params["conv_w"])
    w = w.at[ROW_ATTN1:ROW_ATTN1 + D_P, 0:D_A].set(params["attn_w1"])
    w = w.at[ROW_ATTN2:ROW_ATTN2 + D_A, 0:1].set(params["attn_w2"])
    w = w.at[ROW_FC1:ROW_FC1 + D_E, 0:D_E].set(params["fc1_w"])
    w = w.at[ROW_FC2:ROW_FC2 + D_E, 0:3 * HIDDEN].set(params["fc2_w"])
    w = w.at[ROW_CLS:ROW_CLS + 3 * HIDDEN, 0:REL_NUM].set(params["cls_w"])
    w_slab = w.astype(jnp.bfloat16)                     # pre-cast: halves weight DMA, no in-kernel cast

    b = jnp.zeros((8, 128), jnp.float32)
    b = b.at[0, 0:4 * D_P].set(jnp.concatenate([params["pcnn_be"], params["pcnn_bx"],
                                                params["san_be"], params["san_bx"]], axis=0))
    b = b.at[1, 0:HIDDEN].set(params["conv_b"])
    b = b.at[2, 0:D_A].set(params["attn_b1"])
    b = b.at[3, 0:D_E].set(params["fc1_b"])
    b = b.at[4, 0:3 * HIDDEN].set(params["fc2_b"])
    b = b.at[5, 0:REL_NUM].set(params["cls_b"])
    return w_slab, b


# ---------------- SeG forward: embedding gathers in XLA, rest in ONE Pallas kernel ----------------

def seg_forward(params, X, X_Pos1, X_Pos2, X_Ent1, X_Ent2, X_Mask, X_Scope):
    n, L = X.shape
    assert L % 8 == 0, "L must be a multiple of 8 so in-kernel reshapes are layout no-ops"

    # Entity_Aware_Embedding (table gathers stay in the XLA wrapper)
    xw = params["word_emb"][X]                                            # [N, L, dw]
    xp = jnp.concatenate([xw, params["pos1_emb"][X_Pos1],
                          params["pos2_emb"][X_Pos2]], axis=-1)           # [N, L, D_P]
    e1 = params["word_emb"][X_Ent1][:, None, :]
    e2 = params["word_emb"][X_Ent2][:, None, :]
    xe = jnp.concatenate([xw,
                          jnp.broadcast_to(e1, xw.shape),
                          jnp.broadcast_to(e2, xw.shape)], axis=-1)       # [N, L, D_E]

    mask = X_Mask.astype(jnp.int32)                                       # [N, L] lane-dense

    # bag mean over scopes as a small dense matmul; rows padded to 8 for a dense store
    num_bags = len(X_Scope)
    nb_pad = max(8, ((num_bags + 7) // 8) * 8)
    scope_np = np.zeros((nb_pad, n), dtype=np.float32)
    for i, (s0, s1) in enumerate(X_Scope):
        scope_np[i, s0:s1] = 1.0 / float(s1 - s0)
    scope_mat = jnp.asarray(scope_np)

    w_slab, b_slab = build_slabs(params)

    kernel = functools.partial(_seg_fused_kernel, n=n, L=L, dp=D_P, de=D_E,
                               hid=HIDDEN, da=D_A,
                               lam_pcnn=LAMBDA_PCNN, lam_san=LAMBDA_SAN)
    logits_pad = pl.pallas_call(
        kernel,
        out_shape=jax.ShapeDtypeStruct((nb_pad, CLS_PAD), jnp.float32),
    )(xp, xe, mask, scope_mat, w_slab, b_slab)

    # TODO(synk): nn.Dropout is identity in eval mode; training-mode dropout not implemented.
    return logits_pad[:num_bags, :REL_NUM]                                # [num_bags, rel_num]


# ---------------- main ----------------

if __name__ == "__main__":
    key = jax.random.PRNGKey(0)
    kp, kx, kp1, kp2, ke1, ke2 = jax.random.split(key, 6)

    params = init_params(kp)

    X = jax.random.randint(kx, (N_SENT, SEQ_LEN), 0, VOCAB, dtype=jnp.int32)
    X_Pos1 = jax.random.randint(kp1, (N_SENT, SEQ_LEN), 0, POS_VOCAB, dtype=jnp.int32)
    X_Pos2 = jax.random.randint(kp2, (N_SENT, SEQ_LEN), 0, POS_VOCAB, dtype=jnp.int32)
    X_Ent1 = jax.random.randint(ke1, (N_SENT,), 0, VOCAB, dtype=jnp.int32)
    X_Ent2 = jax.random.randint(ke2, (N_SENT,), 0, VOCAB, dtype=jnp.int32)

    # piecewise mask: 1 / 2 / 3 for the three segments, 0 for padding
    mask_np = np.zeros((N_SENT, SEQ_LEN), dtype=np.int32)
    mask_np[:, 0:5] = 1
    mask_np[:, 5:11] = 2
    mask_np[:, 11:14] = 3
    X_Mask = jnp.asarray(mask_np)

    X_Scope = [(0, 2), (2, 4), (4, 6)]   # 3 bags of 2 sentences each

    logits = seg_forward(params, X, X_Pos1, X_Pos2, X_Ent1, X_Ent2, X_Mask, X_Scope)
    logits = jax.block_until_ready(logits)

    assert logits.shape == (len(X_Scope), REL_NUM)
    assert bool(jnp.all(jnp.isfinite(logits)))
    print("KERNEL_OK")
</pallas_src>

<mosaic_0001>
module attributes {stable_mosaic.version = 11 : i64} {
  func.func @_seg_fused_kernel(%arg0: memref<6x16x24xf32, #tpu.memory_space<vmem>>, %arg1: memref<6x16x48xf32, #tpu.memory_space<vmem>>, %arg2: memref<6x16xi32, #tpu.memory_space<vmem>>, %arg3: memref<8x6xf32, #tpu.memory_space<vmem>>, %arg4: memref<352x128xbf16, #tpu.memory_space<vmem>>, %arg5: memref<8x128xf32, #tpu.memory_space<vmem>>, %arg6: memref<8x128xf32, #tpu.memory_space<vmem>>) attributes {dimension_semantics = [], scalar_prefetch = 0 : i64, scratch_operands = 0 : i64, tpu.core_type = #tpu.core_type<tc>} {
    %c0 = arith.constant 0 : index
    %c0_0 = arith.constant 0 : index
    %c0_1 = arith.constant 0 : index
    %0 = vector.load %arg0[%c0, %c0_0, %c0_1] : memref<6x16x24xf32, #tpu.memory_space<vmem>>, vector<6x16x24xf32>
    %1 = vector.shape_cast %0 : vector<6x16x24xf32> to vector<96x24xf32>
    %c0_2 = arith.constant 0 : index
    %c0_3 = arith.constant 0 : index
    %c0_4 = arith.constant 0 : index
    %2 = vector.load %arg1[%c0_2, %c0_3, %c0_4] : memref<6x16x48xf32, #tpu.memory_space<vmem>>, vector<6x16x48xf32>
    %3 = vector.shape_cast %2 : vector<6x16x48xf32> to vector<96x48xf32>
    %c0_5 = arith.constant 0 : index
    %c0_6 = arith.constant 0 : index
    %4 = vector.load %arg4[%c0_5, %c0_6] : memref<352x128xbf16, #tpu.memory_space<vmem>>, vector<48x96xbf16>
    %c48 = arith.constant 48 : index
    %c0_7 = arith.constant 0 : index
    %5 = vector.load %arg4[%c48, %c0_7] : memref<352x128xbf16, #tpu.memory_space<vmem>>, vector<24x96xbf16>
    %c80 = arith.constant 80 : index
    %c0_8 = arith.constant 0 : index
    %6 = vector.load %arg4[%c80, %c0_8] : memref<352x128xbf16, #tpu.memory_space<vmem>>, vector<24x48xbf16>
    %c112 = arith.constant 112 : index
    %c0_9 = arith.constant 0 : index
    %7 = vector.load %arg4[%c112, %c0_9] : memref<352x128xbf16, #tpu.memory_space<vmem>>, vector<48x1xbf16>
    %c160 = arith.constant 160 : index
    %c0_10 = arith.constant 0 : index
    %8 = vector.load %arg4[%c160, %c0_10] : memref<352x128xbf16, #tpu.memory_space<vmem>>, vector<48x48xbf16>
    %c208 = arith.constant 208 : index
    %c0_11 = arith.constant 0 : index
    %9 = vector.load %arg4[%c208, %c0_11] : memref<352x128xbf16, #tpu.memory_space<vmem>>, vector<48x96xbf16>
    %c256 = arith.constant 256 : index
    %c0_12 = arith.constant 0 : index
    %10 = vector.load %arg4[%c256, %c0_12] : memref<352x128xbf16, #tpu.memory_space<vmem>>, vector<96x128xbf16>
    %c0_13 = arith.constant 0 : index
    %c0_14 = arith.constant 0 : index
    %11 = vector.load %arg5[%c0_13, %c0_14] : memref<8x128xf32, #tpu.memory_space<vmem>>, vector<8x128xf32>
    %12 = vector.extract_strided_slice %11 {offsets = [0, 0], sizes = [1, 96], strides = [1, 1]} : vector<8x128xf32> to vector<1x96xf32>
    %13 = vector.extract_strided_slice %11 {offsets = [1, 0], sizes = [1, 32], strides = [1, 1]} : vector<8x128xf32> to vector<1x32xf32>
    %14 = vector.extract_strided_slice %11 {offsets = [2, 0], sizes = [1, 48], strides = [1, 1]} : vector<8x128xf32> to vector<1x48xf32>
    %15 = vector.extract_strided_slice %11 {offsets = [3, 0], sizes = [1, 48], strides = [1, 1]} : vector<8x128xf32> to vector<1x48xf32>
    %16 = vector.extract_strided_slice %11 {offsets = [4, 0], sizes = [1, 96], strides = [1, 1]} : vector<8x128xf32> to vector<1x96xf32>
    %17 = vector.extract_strided_slice %11 {offsets = [5, 0], sizes = [1, 128], strides = [1, 1]} : vector<8x128xf32> to vector<1x128xf32>
    %18 = arith.truncf %3 : vector<96x48xf32> to vector<96x48xbf16>
    %cst = arith.constant dense<0.000000e+00> : vector<96x96xf32>
    %19 = tpu.matmul %18, %4, %cst {dimension_numbers = #tpu.dot_dimension_numbers<[1], [0], [0], [1], [0, 0, 1, 1], [], []>} : vector<96x48xbf16>, vector<48x96xbf16>, vector<96x96xf32> -> vector<96x96xf32>
    %20 = vector.broadcast %12 : vector<1x96xf32> to vector<96x96xf32>
    %21 = arith.addf %19, %20 : vector<96x96xf32>
    %22 = vector.extract_strided_slice %21 {offsets = [0, 0], sizes = [96, 24], strides = [1, 1]} : vector<96x96xf32> to vector<96x24xf32>
    %cst_15 = arith.constant 5.000000e-02 : f32
    %23 = vector.broadcast %cst_15 : f32 to vector<96x24xf32>
    %24 = arith.mulf %23, %22 : vector<96x24xf32>
    %25 = arith.negf %24 : vector<96x24xf32>
    %26 = math.exp %25 : vector<96x24xf32>
    %cst_16 = arith.constant 1.000000e+00 : f32
    %27 = vector.broadcast %cst_16 : f32 to vector<96x24xf32>
    %28 = arith.addf %27, %26 : vector<96x24xf32>
    %29 = arith.divf %27, %28 : vector<96x24xf32>
    %30 = arith.mulf %29, %1 : vector<96x24xf32>
    %cst_17 = arith.constant 1.000000e+00 : f32
    %31 = vector.broadcast %cst_17 : f32 to vector<96x24xf32>
    %32 = arith.subf %31, %29 : vector<96x24xf32>
    %33 = vector.extract_strided_slice %21 {offsets = [0, 24], sizes = [96, 24], strides = [1, 1]} : vector<96x96xf32> to vector<96x24xf32>
    %34 = arith.mulf %32, %33 : vector<96x24xf32>
    %35 = arith.addf %30, %34 : vector<96x24xf32>
    %36 = vector.extract_strided_slice %21 {offsets = [0, 48], sizes = [96, 24], strides = [1, 1]} : vector<96x96xf32> to vector<96x24xf32>
    %cst_18 = arith.constant 1.000000e+00 : f32
    %37 = vector.broadcast %cst_18 : f32 to vector<96x24xf32>
    %38 = arith.mulf %37, %36 : vector<96x24xf32>
    %39 = arith.negf %38 : vector<96x24xf32>
    %40 = math.exp %39 : vector<96x24xf32>
    %cst_19 = arith.constant 1.000000e+00 : f32
    %41 = vector.broadcast %cst_19 : f32 to vector<96x24xf32>
    %42 = arith.addf %41, %40 : vector<96x24xf32>
    %43 = arith.divf %41, %42 : vector<96x24xf32>
    %44 = arith.mulf %43, %1 : vector<96x24xf32>
    %cst_20 = arith.constant 1.000000e+00 : f32
    %45 = vector.broadcast %cst_20 : f32 to vector<96x24xf32>
    %46 = arith.subf %45, %43 : vector<96x24xf32>
    %47 = vector.extract_strided_slice %21 {offsets = [0, 72], sizes = [96, 24], strides = [1, 1]} : vector<96x96xf32> to vector<96x24xf32>
    %48 = arith.mulf %46, %47 : vector<96x24xf32>
    %49 = arith.addf %44, %48 : vector<96x24xf32>
    %50 = arith.truncf %35 : vector<96x24xf32> to vector<96x24xbf16>
    %cst_21 = arith.constant dense<0.000000e+00> : vector<96x96xf32>
    %51 = tpu.matmul %50, %5, %cst_21 {dimension_numbers = #tpu.dot_dimension_numbers<[1], [0], [0], [1], [0, 0, 1, 1], [], []>} : vector<96x24xbf16>, vector<24x96xbf16>, vector<96x96xf32> -> vector<96x96xf32>
    %52 = tpu.iota {dimensions = array<i32: 1>} : vector<6x16x1xi32>
    %53 = vector.shape_cast %52 : vector<6x16x1xi32> to vector<96x1xi32>
    %c0_i32 = arith.constant 0 : i32
    %54 = vector.broadcast %c0_i32 : i32 to vector<96x1xi32>
    %55 = arith.cmpi eq, %53, %54 : vector<96x1xi32>
    %56 = vector.extract_strided_slice %51 {offsets = [0, 0], sizes = [96, 32], strides = [1, 1]} : vector<96x96xf32> to vector<96x32xf32>
    %c1_i32 = arith.constant 1 : i32
    %57 = tpu.dynamic_rotate %56 by %c1_i32 dim 0 : vector<96x32xf32>, i32 -> vector<96x32xf32>
    %cst_22 = arith.constant 0.000000e+00 : f32
    %58 = vector.shape_cast %55 : vector<96x1xi1> to vector<96x1xi1>
    %59 = vector.broadcast %58 : vector<96x1xi1> to vector<96x32xi1>
    %60 = vector.broadcast %cst_22 : f32 to vector<96x32xf32>
    %61 = arith.select %59, %60, %57 : vector<96x32xi1>, vector<96x32xf32>
    %62 = vector.extract_strided_slice %51 {offsets = [0, 32], sizes = [96, 32], strides = [1, 1]} : vector<96x96xf32> to vector<96x32xf32>
    %63 = arith.addf %61, %62 : vector<96x32xf32>
    %c15_i32 = arith.constant 15 : i32
    %64 = vector.broadcast %c15_i32 : i32 to vector<96x1xi32>
    %65 = arith.cmpi eq, %53, %64 : vector<96x1xi32>
    %66 = vector.extract_strided_slice %51 {offsets = [0, 64], sizes = [96, 32], strides = [1, 1]} : vector<96x96xf32> to vector<96x32xf32>
    %c95_i32 = arith.constant 95 : i32
    %67 = tpu.dynamic_rotate %66 by %c95_i32 dim 0 : vector<96x32xf32>, i32 -> vector<96x32xf32>
    %cst_23 = arith.constant 0.000000e+00 : f32
    %68 = vector.shape_cast %65 : vector<96x1xi1> to vector<96x1xi1>
    %69 = vector.broadcast %68 : vector<96x1xi1> to vector<96x32xi1>
    %70 = vector.broadcast %cst_23 : f32 to vector<96x32xf32>
    %71 = arith.select %69, %70, %67 : vector<96x32xi1>, vector<96x32xf32>
    %72 = arith.addf %63, %71 : vector<96x32xf32>
    %73 = vector.broadcast %13 : vector<1x32xf32> to vector<96x32xf32>
    %74 = arith.addf %72, %73 : vector<96x32xf32>
    %75 = vector.shape_cast %74 : vector<96x32xf32> to vector<6x16x32xf32>
    %c0_24 = arith.constant 0 : index
    %c0_25 = arith.constant 0 : index
    %76 = vector.load %arg2[%c0_24, %c0_25] : memref<6x16xi32, #tpu.memory_space<vmem>>, vector<6x16xi32>
    %77 = vector.shape_cast %76 : vector<6x16xi32> to vector<6x16x1xi32>
    %c1_i32_26 = arith.constant 1 : i32
    %78 = vector.broadcast %c1_i32_26 : i32 to vector<6x16x1xi32>
    %79 = arith.cmpi eq, %77, %78 : vector<6x16x1xi32>
    %cst_27 = arith.constant -1.000000e+30 : f32
    %80 = vector.shape_cast %79 : vector<6x16x1xi1> to vector<6x16x1xi1>
    %81 = vector.broadcast %80 : vector<6x16x1xi1> to vector<6x16x32xi1>
    %82 = vector.broadcast %cst_27 : f32 to vector<6x16x32xf32>
    %83 = arith.select %81, %75, %82 : vector<6x16x32xi1>, vector<6x16x32xf32>
    %cst_28 = arith.constant dense<0xFF800000> : vector<6x32xf32>
    %84 = vector.multi_reduction <maximumf>, %83, %cst_28 [1] : vector<6x16x32xf32> to vector<6x32xf32>
    %c2_i32 = arith.constant 2 : i32
    %85 = vector.broadcast %c2_i32 : i32 to vector<6x16x1xi32>
    %86 = arith.cmpi eq, %77, %85 : vector<6x16x1xi32>
    %cst_29 = arith.constant -1.000000e+30 : f32
    %87 = vector.shape_cast %86 : vector<6x16x1xi1> to vector<6x16x1xi1>
    %88 = vector.broadcast %87 : vector<6x16x1xi1> to vector<6x16x32xi1>
    %89 = vector.broadcast %cst_29 : f32 to vector<6x16x32xf32>
    %90 = arith.select %88, %75, %89 : vector<6x16x32xi1>, vector<6x16x32xf32>
    %cst_30 = arith.constant dense<0xFF800000> : vector<6x32xf32>
    %91 = vector.multi_reduction <maximumf>, %90, %cst_30 [1] : vector<6x16x32xf32> to vector<6x32xf32>
    %c3_i32 = arith.constant 3 : i32
    %92 = vector.broadcast %c3_i32 : i32 to vector<6x16x1xi32>
    %93 = arith.cmpi eq, %77, %92 : vector<6x16x1xi32>
    %cst_31 = arith.constant -1.000000e+30 : f32
    %94 = vector.shape_cast %93 : vector<6x16x1xi1> to vector<6x16x1xi1>
    %95 = vector.broadcast %94 : vector<6x16x1xi1> to vector<6x16x32xi1>
    %96 = vector.broadcast %cst_31 : f32 to vector<6x16x32xf32>
    %97 = arith.select %95, %75, %96 : vector<6x16x32xi1>, vector<6x16x32xf32>
    %cst_32 = arith.constant dense<0xFF800000> : vector<6x32xf32>
    %98 = vector.multi_reduction <maximumf>, %97, %cst_32 [1] : vector<6x16x32xf32> to vector<6x32xf32>
    %99 = tpu.concatenate %84, %91, %98 in 1 : vector<6x32xf32>, vector<6x32xf32>, vector<6x32xf32> -> vector<6x96xf32>
    %cst_33 = arith.constant 0.000000e+00 : f32
    %100 = vector.broadcast %cst_33 : f32 to vector<6x96xf32>
    %101 = arith.maximumf %99, %100 : vector<6x96xf32>
    %102 = arith.truncf %49 : vector<96x24xf32> to vector<96x24xbf16>
    %cst_34 = arith.constant dense<0.000000e+00> : vector<96x48xf32>
    %103 = tpu.matmul %102, %6, %cst_34 {dimension_numbers = #tpu.dot_dimension_numbers<[1], [0], [0], [1], [0, 0, 1, 1], [], []>} : vector<96x24xbf16>, vector<24x48xbf16>, vector<96x48xf32> -> vector<96x48xf32>
    %104 = vector.broadcast %14 : vector<1x48xf32> to vector<96x48xf32>
    %105 = arith.addf %103, %104 : vector<96x48xf32>
    %106 = math.tanh %105 : vector<96x48xf32>
    %107 = arith.truncf %106 : vector<96x48xf32> to vector<96x48xbf16>
    %cst_35 = arith.constant dense<0.000000e+00> : vector<96x1xf32>
    %108 = tpu.matmul %107, %7, %cst_35 {dimension_numbers = #tpu.dot_dimension_numbers<[1], [0], [0], [1], [0, 0, 1, 1], [], []>} : vector<96x48xbf16>, vector<48x1xbf16>, vector<96x1xf32> -> vector<96x1xf32>
    %109 = vector.shape_cast %108 : vector<96x1xf32> to vector<6x16x1xf32>
    %cst_36 = arith.constant dense<0xFF800000> : vector<6x1xf32>
    %110 = vector.multi_reduction <maximumf>, %109, %cst_36 [1] : vector<6x16x1xf32> to vector<6x1xf32>
    %111 = vector.shape_cast %110 : vector<6x1xf32> to vector<6x1x1xf32>
    %112 = vector.broadcast %111 : vector<6x1x1xf32> to vector<6x16x1xf32>
    %113 = arith.subf %109, %112 : vector<6x16x1xf32>
    %114 = math.exp %113 : vector<6x16x1xf32>
    %cst_37 = arith.constant dense<0.000000e+00> : vector<6x1xf32>
    %115 = vector.multi_reduction <add>, %114, %cst_37 [1] : vector<6x16x1xf32> to vector<6x1xf32>
    %116 = vector.shape_cast %115 : vector<6x1xf32> to vector<6x1x1xf32>
    %117 = tpu.reciprocal %116 {approx = true} : vector<6x1x1xf32> -> vector<6x1x1xf32>
    %118 = vector.broadcast %117 : vector<6x1x1xf32> to vector<6x16x1xf32>
    %119 = arith.mulf %114, %118 : vector<6x16x1xf32>
    %120 = vector.broadcast %119 : vector<6x16x1xf32> to vector<6x16x48xf32>
    %121 = arith.mulf %120, %2 : vector<6x16x48xf32>
    %cst_38 = arith.constant dense<0.000000e+00> : vector<6x48xf32>
    %122 = vector.multi_reduction <add>, %121, %cst_38 [1] : vector<6x16x48xf32> to vector<6x48xf32>
    %123 = arith.truncf %122 : vector<6x48xf32> to vector<6x48xbf16>
    %cst_39 = arith.constant dense<0.000000e+00> : vector<6x48xf32>
    %124 = tpu.matmul %123, %8, %cst_39 {dimension_numbers = #tpu.dot_dimension_numbers<[1], [0], [0], [1], [0, 0, 1, 1], [], []>} : vector<6x48xbf16>, vector<48x48xbf16>, vector<6x48xf32> -> vector<6x48xf32>
    %125 = vector.broadcast %15 : vector<1x48xf32> to vector<6x48xf32>
    %126 = arith.addf %124, %125 : vector<6x48xf32>
    %127 = math.tanh %126 : vector<6x48xf32>
    %128 = arith.truncf %127 : vector<6x48xf32> to vector<6x48xbf16>
    %cst_40 = arith.constant dense<0.000000e+00> : vector<6x96xf32>
    %129 = tpu.matmul %128, %9, %cst_40 {dimension_numbers = #tpu.dot_dimension_numbers<[1], [0], [0], [1], [0, 0, 1, 1], [], []>} : vector<6x48xbf16>, vector<48x96xbf16>, vector<6x96xf32> -> vector<6x96xf32>
    %130 = vector.broadcast %16 : vector<1x96xf32> to vector<6x96xf32>
    %131 = arith.addf %129, %130 : vector<6x96xf32>
    %132 = arith.negf %131 : vector<6x96xf32>
    %133 = math.exp %132 : vector<6x96xf32>
    %cst_41 = arith.constant 1.000000e+00 : f32
    %134 = vector.broadcast %cst_41 : f32 to vector<6x96xf32>
    %135 = arith.addf %134, %133 : vector<6x96xf32>
    %136 = arith.divf %134, %135 : vector<6x96xf32>
    %137 = arith.mulf %136, %101 : vector<6x96xf32>
    %c0_42 = arith.constant 0 : index
    %c0_43 = arith.constant 0 : index
    %138 = vector.load %arg3[%c0_42, %c0_43] : memref<8x6xf32, #tpu.memory_space<vmem>>, vector<8x6xf32>
    %139 = arith.truncf %138 : vector<8x6xf32> to vector<8x6xbf16>
    %140 = arith.truncf %137 : vector<6x96xf32> to vector<6x96xbf16>
    %cst_44 = arith.constant dense<0.000000e+00> : vector<8x96xf32>
    %141 = tpu.matmul %139, %140, %cst_44 {dimension_numbers = #tpu.dot_dimension_numbers<[1], [0], [0], [1], [0, 0, 1, 1], [], []>} : vector<8x6xbf16>, vector<6x96xbf16>, vector<8x96xf32> -> vector<8x96xf32>
    %142 = arith.truncf %141 : vector<8x96xf32> to vector<8x96xbf16>
    %cst_45 = arith.constant dense<0.000000e+00> : vector<8x128xf32>
    %143 = tpu.matmul %142, %10, %cst_45 {dimension_numbers = #tpu.dot_dimension_numbers<[1], [0], [0], [1], [0, 0, 1, 1], [], []>} : vector<8x96xbf16>, vector<96x128xbf16>, vector<8x128xf32> -> vector<8x128xf32>
    %144 = vector.broadcast %17 : vector<1x128xf32> to vector<8x128xf32>
    %145 = arith.addf %143, %144 : vector<8x128xf32>
    %c0_46 = arith.constant 0 : index
    %c0_47 = arith.constant 0 : index
    %146 = vector.load %arg6[%c0_46, %c0_47] : memref<8x128xf32, #tpu.memory_space<vmem>>, vector<8x128xf32>
    tpu.vector_store %arg6[%c0_46, %c0_47], %145 {strides = array<i32>} : memref<8x128xf32, #tpu.memory_space<vmem>>, vector<8x128xf32>,
    return
  }
}

</mosaic_0001>

<bundles_post_ra>
// kernel: tpu_custom_call.1
= control target key start
LH: loop header
LB: loop body
LE: loop exit
PB: predicated region body
PF: predicated region fallthrough
CT: control target
= control target key end

     0   :  { %11 = vsyncpa [#allocation3], 0  ;;  %s3707_s0 = inlined_call_operand.hbm [shape: f32[6,16,24], index: 0, kind: input, shape index: {}]   ;;  %s3708_s1 = inlined_call_operand.hbm [shape: f32[6,16,48], index: 1, kind: input, shape index: {}]   ;;  %s3709_s2 = inlined_call_operand.hbm [shape: s32[6,16], index: 2, kind: input, shape index: {}]   ;;  %s3710_s3 = inlined_call_operand.hbm [shape: f32[8,6], index: 3, kind: input, shape index: {}]   ;;  %s3711_s4 = inlined_call_operand.hbm [shape: bf16[352,128], index: 4, kind: input, shape index: {}]   ;;  %s3712_s5 = inlined_call_operand.vmem [shape: f32[8,128], index: 5, kind: input, shape index: {}]   ;;  %s3713_s6 = inlined_call_operand.hbm [shape: f32[8,128], index: 6, kind: output, shape index: {}]  }
   0x1   :  { %12 = vsyncpa [#allocation6], 0 }
   0x2   :  { %13 = vsyncpa [#allocation9], 0 }
   0x3   :  { %14 = vsyncpa [#allocation4], 0  ;;  %s2856_s21 = smov [#allocation5]   ;;  %s2857_s23 = smov [#allocation8]  }
   0x4   :  { %s32_s22 = sshll.u32 %s2856_s21, 4  ;;  %s55_s24 = sshll.u32 %s2857_s23, 4  ;;  %s33_s22 = int_to_ptr.vmem [resolvable:$true] %s32_s22  ;;  %s56_s24 = int_to_ptr.vmem [resolvable:$true] %s55_s24 }
   0x5   :  { %s2736_s25 = scalar_lea.vmem %s33_s22, 1536  ;;  %p2741_p1 = scmp.lt.s32.totalorder %s33_s22, %s33_s22 }
   0x6   :  { %p2737_p0 = scmp.ne.s32.totalorder %s33_s22, %s2736_s25  ;;  %p2742_p2 = scmp.lt.s32.totalorder %s2736_s25, %s2736_s25 }
   0x8   :  { %p2743_p3 = por %p2742_p2, %p2741_p1 }
   0xa   :  { %p2744_p4 = pnand %p2743_p3, %p2737_p0 }
   0xc   :  { %2747 = shalt.err (!%p2744_p4)
}
   0xd   :  { %s2858_s26 = smov 128   ;;  %s2859_s27 = smov 8  }
   0xe   :  { %38 = dma.hbm_to_vmem [thread:$0]  %s3708_s1, 1536, %s33_s22, [#allocation6], %s2858_s26, %s2858_s26, %s2859_s27  }
   0xf   :  { %s2756_s30 = scalar_lea.vmem %s56_s24, 128  ;;  %p2761_p6 = scmp.lt.s32.totalorder %s56_s24, %s56_s24 }
  0x10   :  { %p2757_p5 = scmp.ne.s32.totalorder %s56_s24, %s2756_s30  ;;  %p2762_p7 = scmp.lt.s32.totalorder %s2756_s30, %s2756_s30 }
  0x12   :  { %p2763_p8 = por %p2762_p7, %p2761_p6 }
  0x14   :  { %p2764_p9 = pnand %p2763_p8, %p2757_p5 }
  0x16   :  { %2767 = shalt.err (!%p2764_p9)
}
  0x17   :  { %58 = dma.hbm_to_vmem [thread:$0]  %s3710_s3, 128, %s56_s24, [#allocation9]  }
  0x18   :  { %s2860_s9 = smov [#allocation2]   ;;  %s2861_s11 = smov [#allocation7]  }
  0x19   :  { %s20_s10 = sshll.u32 %s2860_s9, 4  ;;  %s45_s12 = sshll.u32 %s2861_s11, 4  ;;  %s21_s10 = int_to_ptr.vmem [resolvable:$true] %s20_s10  ;;  %s46_s12 = int_to_ptr.vmem [resolvable:$true] %s45_s12 }
  0x1a   :  { %s2776_s13 = scalar_lea.vmem %s21_s10, 1536  ;;  %p2781_p11 = scmp.lt.s32.totalorder %s21_s10, %s21_s10 }
  0x1b   :  { %p2777_p10 = scmp.ne.s32.totalorder %s21_s10, %s2776_s13  ;;  %p2782_p12 = scmp.lt.s32.totalorder %s2776_s13, %s2776_s13 }
  0x1d   :  { %p2783_p13 = por %p2782_p12, %p2781_p11 }
  0x1f   :  { %p2784_p0 = pnand %p2783_p13, %p2777_p10 }
  0x21   :  { %2787 = shalt.err (!%p2784_p0)
}
  0x22   :  { %26 = dma.hbm_to_vmem [thread:$0]  %s3707_s0, 1536, %s21_s10, [#allocation3], %s2858_s26, %s2858_s26, %s2859_s27  }
  0x23   :  { %s2796_s15 = scalar_lea.vmem %s46_s12, 128  ;;  %p2801_p2 = scmp.lt.s32.totalorder %s46_s12, %s46_s12 }
  0x24   :  { %p2797_p1 = scmp.ne.s32.totalorder %s46_s12, %s2796_s15  ;;  %p2802_p3 = scmp.lt.s32.totalorder %s2796_s15, %s2796_s15 }
  0x26   :  { %p2803_p4 = por %p2802_p3, %p2801_p2 }
  0x28   :  { %p2804_p5 = pnand %p2803_p4, %p2797_p1 }
  0x2a   :  { %2807 = shalt.err (!%p2804_p5)
}
  0x2b   :  { %48 = dma.hbm_to_vmem [thread:$0]  %s3709_s2, 128, %s46_s12, [#allocation6]  }
  0x2c   :  { %s2862_s17 = smov [#allocation10]  }
  0x2d   :  { %s64_s18 = sshll.u32 %s2862_s17, 4  ;;  %s65_s18 = int_to_ptr.vmem [resolvable:$true] %s64_s18 }
  0x2e   :  { %s2816_s19 = scalar_lea.vmem %s65_s18, 2816  ;;  %p2821_p7 = scmp.lt.s32.totalorder %s65_s18, %s65_s18 }
  0x2f   :  { %p2817_p6 = scmp.ne.s32.totalorder %s65_s18, %s2816_s19  ;;  %p2822_p8 = scmp.lt.s32.totalorder %s2816_s19, %s2816_s19 }
  0x31   :  { %p2823_p9 = por %p2822_p8, %p2821_p7 }
  0x33   :  { %p2824_p10 = pnand %p2823_p9, %p2817_p6 }
  0x35   :  { %2827 = shalt.err (!%p2824_p10)
}
  0x36   :  { %s2863_s0 = smov 64   ;;  %s2864_s20 = smov 4  }
  0x37   :  { %70 = dma.hbm_to_vmem [thread:$0]  %s3711_s4, 2816, %s65_s18, [#allocation9], %s2863_s0, %s2863_s0, %s2864_s20  }
  0x38   :  { %2848 = dma.done.wait [#allocation3], 1536  }
  0x39   :  { %2849 = vsyncadd [#allocation3], 4294965760 }
  0x3a   :  { %2850 = dma.done.wait [#allocation6], 1664  }
  0x3b   :  { %2851 = vsyncadd [#allocation6], 4294965632 }
  0x3c   :  { %2852 = dma.done.wait [#allocation9], 2944  }
  0x3d   :  { %2853 = vsyncadd [#allocation9], 4294964352  ;;  %v2531_v0 = vld [vmem:[#allocation10 + $0x10] sm:$0xff]   ;;  %v2532_v1 = vld [vmem:[#allocation10 + $0x8] sm:$0xff]   ;;  %vm184_vm0 = vcmask 392192   ;;  %s2865_s2 = smov 48   ;;  %v162_v29 = vlaneseq }
  0x3e   :  { %2393 = vmatprep.subr.bf16.mxu0 %v2531_v0  ;;  %2503 = vmatprep.subr.bf16.mxu1 %v2531_v0  ;;  %v101_v2 = vld [vmem:[#allocation5] sm:$0xff]  ;;  %v102_v3 = vld [vmem:[#allocation5 + $0x8] sm:$0xff]  ;;  %v2533_v5 = vld [vmem:[#allocation10] sm:$0xff]   ;;  %s2866_s24 = smov 104   ;;  %vm666_vm1 = vcmask 1043456   ;;  %vm647_vm2 = vcmask 195584  }
  0x3f   :  { %2394 = vmatpush3.bf16.msra.mxu0 %v2531_v0  ;;  %2506 = vmatpush3.bf16.msra.mxu1 %v2531_v0  ;;  %v109_v4 = vld [vmem:[#allocation5 + $0x40] sm:$0xff]  ;;  %v156_v6 = vpack.c.bf16 %v102_v3, %v101_v2  ;;  %v110_v7 = vld [vmem:[#allocation5 + $0x48] sm:$0xff]  ;;  %v103_v9 = vld [vmem:[#allocation5 + $0x10] sm:$0xff]  ;;  %v2964_v30 = vshrl.u32 %v162_v29, 7  ;;  %s2867_s25 = smov 80   ;;  %vm1661_vm3 = vcmask 7168  }
  0x40   :  { %2395 = vmatprep.subr.bf16.mxu0 %v2532_v1  ;;  %2504 = vmatprep.subr.bf16.mxu1 %v2532_v1  ;;  %v160_v8 = vpack.c.bf16 %v110_v7, %v109_v4  ;;  %v104_v10 = vld [vmem:[#allocation5 + $0x18] sm:$0xff]  ;;  %v111_v11 = vld [vmem:[#allocation5 + $0x50] sm:$0xff]  ;;  %v2927_v13 = vld [vmem:[#allocation2] sm:$0xff]  ;;  %s2869_s26 = smov 96   ;;  %vm2871_vm4 = vmmov 0   ;;  %vm1344_vm5 = vcmask 1041409  }
  0x41   :  { %2399 = vmatprep.mubr.msk.bf16.mxu0 %vm184_vm0, %v156_v6  ;;  %v112_v12 = vld [vmem:[#allocation5 + $0x58] sm:$0xff]  ;;  %v2929_v14 = vld [vmem:[#allocation2 + $0x10] sm:$0xff]  ;;  %v105_v15 = vld [vmem:[#allocation5 + $0x20] sm:$0xff]  ;;  %548 = vrot.lane.b32.xlu1 %v2927_v13, %s2865_s2  ;;  %v157_v18 = vpack.c.bf16 %v104_v10, %v103_v9  ;;  %v164_v31 = vsub.s32 0, %v2964_v30  ;;  %vm1346_vm6 = vcmask 1042434   ;;  %vm1348_vm7 = vcmask 1043459  }
  0x42   :  { %v106_v16 = vld [vmem:[#allocation5 + $0x28] sm:$0xff]  ;;  %2407 = vmatprep.mubr.msk.bf16.mxu1 %vm184_vm0, %v160_v8  ;;  %v161_v19 = vpack.c.bf16 %v112_v12, %v111_v11  ;;  %552 = vrot.lane.b32.xlu0 %v2929_v14, %s2865_s2  ;;  %v2938_v20 = vld [vmem:[#allocation2 + $0x20] sm:$0xff]  ;;  %v2940_v22 = vld [vmem:[#allocation2 + $0x18] sm:$0xff]  ;;  %vm1350_vm8 = vcmask 1044484   ;;  %vm1352_vm9 = vcmask 1045509   ;;  %vm768_vm10 = vcmp.lt.s32.totalorder %v2964_v30, 1 }
  0x43   :  { %2396 = vmatpush3.bf16.msra.mxu0 %v2532_v1  ;;  %2507 = vmatpush3.bf16.msra.mxu1 %v2532_v1  ;;  %v2934_v17 = vld [vmem:[#allocation2 + $0x8] sm:$0xff]  ;;  %v158_v21 = vpack.c.bf16 %v106_v16, %v105_v15  ;;  %v107_v23 = vld [vmem:[#allocation5 + $0x30] sm:$0xff]  ;;  %v108_v24 = vld [vmem:[#allocation5 + $0x38] sm:$0xff]  ;;  %vm754_vm11 = vcmp.eq.s32.totalorder %v2964_v30, 0  ;;  %vm907_vm12 = vcmp.lt.s32.totalorder %v2964_v30, 7  ;;  %vm1079_vm14 = vcmask 261120  }
  0x44   :  { %2397 = vmatprep.subr.bf16.mxu0 %v2533_v5  ;;  %2505 = vmatprep.subr.bf16.mxu1 %v2533_v5  ;;  %v2946_v25 = vld [vmem:[#allocation2 + $0x30] sm:$0xff]  ;;  %v2951_v26 = vld [vmem:[#allocation2 + $0x28] sm:$0xff]  ;;  %v159_v27 = vpack.c.bf16 %v108_v24, %v107_v23  ;;  %v2960_v28 = vld [vmem:[#allocation2 + $0x38] sm:$0xff]  ;;  %s2873_s29 = smov [#allocation11]  }
  0x45   :  { %550 = vrot.lane.b32.xlu1 %v2934_v17, %s2865_s2  ;;  %v2970_v32 = vld [vmem:[%s3712_s5] sm:$0xff]  ;;  %v2534_v44 = vld [vmem:[#allocation10 + $0x20] ss:$0 sps:$4 sm:$0xff]   ;;  %v2535_v60 = vld [vmem:[#allocation10 + $0x18] sm:$0xff]   ;;  %s2256_s30 = sshll.u32 %s2873_s29, 4  ;;  %s2257_s30 = int_to_ptr.vmem [resolvable:$true] %s2256_s30 }
  0x46   :  { %556 = vrot.lane.b32.xlu0 %v2938_v20, %s2865_s2  ;;  %v165_v33 = vrot.slane %v2970_v32, %v164_v31  ;;  %v668_v63 = vsel %vm666_vm1, %v2534_v44, 0  ;;  %v98_v7 = vld [vmem:[#allocation2 + $0x48] sm:$0xff]  ;;  %v97_v9 = vld [vmem:[#allocation2 + $0x40] sm:$0xff]  ;;  %v100_v16 = vld [vmem:[#allocation2 + $0x58] sm:$0xff]  ;;  %s2828_s7 = scalar_lea.vmem %s2257_s30, 128  ;;  %p2833_p12 = scmp.lt.s32.totalorder %s2257_s30, %s2257_s30 }
  0x47   :  { %2398 = vmatpush3.bf16.msra.mxu0 %v2533_v5  ;;  %2508 = vmatpush3.bf16.msra.mxu1 %v2533_v5  ;;  %v2536_v12 = vld [vmem:[#allocation10 + $0x30] ss:$0 sps:$4 sm:$0xff]   ;;  %p2829_p11 = scmp.ne.s32.totalorder %s2257_s30, %s2828_s7  ;;  %p2834_p13 = scmp.lt.s32.totalorder %s2828_s7, %s2828_s7 }
  0x48   :  { %2509 = vmatprep.subr.msk.bf16.mxu1 %vm666_vm1, %v2534_v44 }
  0x49   :  { %554 = vrot.lane.b32.xlu1 %v2940_v22, %s2865_s2  ;;  %p2835_p0 = por %p2834_p13, %p2833_p12 }
  0x4a   :  { %2400 = vmatmul.mubr.msk.bf16.vlgmr.msra.gmra.mxu0 %vm184_vm0, %v157_v18  ;;  %2408 = vmatmul.mubr.msk.bf16.vlgmr.msra.gmra.mxu1 %vm184_vm0, %v161_v19  ;;  %v3031_v18 = vsel %vm666_vm1, %v2536_v12, 0 }
  0x4b   :  { %2403 = vmatprep.mubr.msk.bf16.mxu0 %vm184_vm0, %v158_v21  ;;  %560 = vrot.lane.b32.xlu0 %v2946_v25, %s2865_s2  ;;  %v99_v21 = vld [vmem:[#allocation2 + $0x50] sm:$0xff]  ;;  %p2836_p1 = pnand %p2835_p0, %p2829_p11 }
  0x4c   :  { %2412 = vmatpush3.bf16.msra.mxu1 %v668_v63 }
  0x4d   :  { %558 = vrot.lane.b32.xlu1 %v2951_v26, %s2865_s2  ;;  %2413 = vmatprep.subr.bf16.mxu1 %v2535_v60 }
  0x50   :  { %2414 = vmatpush3.bf16.msra.mxu1 %v2535_v60 }
  0x51   :  { %562 = vrot.lane.b32.xlu1 %v2960_v28, %s2865_s2  ;;  %2510 = vmatprep.subr.msk.bf16.mxu1 %vm666_vm1, %v2536_v12 }
  0x52   :  { %2404 = vmatmul.mubr.msk.bf16.gmra.mxu0 %vm184_vm0, %v159_v27 }
 0x10a   :  { %v2401_v34 = vpop.f32.mrf.mxu0  ;;  %v2409_v35 = vpop.f32.mrf.mxu1 }
 0x10b   :  { %v2975_v36 = vadd.f32 %v2401_v34, %v165_v33  ;;  %v2977_v37 = vadd.f32 %v2409_v35, %v165_v33 }
 0x10c   :  { %v237_v38 = vpop.f32.mrf.mxu0  ;;  %v269_v39 = vpop.f32.mrf.mxu1 }
 0x10d   :  { %v2286_v40 = vmul.f32 -0.05, %v2977_v37  ;;  %408 = vrot.lane.b32.xlu0 %v2975_v36, %s2866_s24  ;;  %v2982_v41 = vadd.f32 %v269_v39, %v165_v33  ;;  %v2984_v46 = vadd.f32 %v237_v38, %v165_v33 }
 0x10e   :  { %v2402_v42 = vpop.f32.mrf.mxu0  ;;  %v2410_v43 = vpop.f32.mrf.mxu1 }
 0x10f   :  { %v328_v45 = vmul.f32 1.442695, %v2286_v40  ;;  %v2284_v47 = vmul.f32 -0.05, %v2982_v41  ;;  %v2988_v50 = vadd.f32 %v2402_v42, %v165_v33  ;;  %v2990_v51 = vadd.f32 %v2410_v43, %v165_v33 }
 0x110   :  { %v240_v48 = vpop.f32.mrf.mxu0  ;;  %v272_v49 = vpop.f32.mrf.mxu1  ;;  %v2278_v40 = vmul.f32 -0.05, %v2975_v36  ;;  %v2290_v43 = vmul.f32 -1.442695, %v2975_v36  ;;  %v2276_v44 = vmul.f32 -0.05, %v2984_v46 }
 0x111   :  { %404 = vrot.lane.b32.xlu0 %v2984_v46, %s2866_s24  ;;  %2553 = vpow2.f32 %v328_v45  ;;  %v324_v52 = vmul.f32 1.442695, %v2284_v47  ;;  %v2994_v53 = vadd.f32 %v272_v49, %v165_v33  ;;  %v2287_v55 = vmul.f32 -0.05, %v2990_v51  ;;  %410 = vrot.lane.b32.xlu1 %v2988_v50, %s2866_s24 }
 0x112   :  { %v2405_v54 = vpop.f32.mrf.mxu0  ;;  %v3002_v61 = vadd.f32 %v240_v48, %v165_v33  ;;  %v2279_v42 = vmul.f32 -0.05, %v2988_v50  ;;  %v312_v45 = vmul.f32 1.442695, %v2278_v40  ;;  %v2291_v48 = vmul.f32 -1.442695, %v2988_v50  ;;  %v553_v40 = vpop.permute.xlu0 %552 }
 0x113   :  { %2555 = vpow2.f32 %v324_v52  ;;  %v330_v57 = vmul.f32 1.442695, %v2287_v55  ;;  %v2285_v58 = vmul.f32 -0.05, %v2994_v53  ;;  %v3011_v2 = vadd.f32 %v2405_v54, %v165_v33 }
 0x114   :  { %v253_v56 = vpop.f32.mrf.mxu0  ;;  %v314_v47 = vmul.f32 1.442695, %v2279_v42  ;;  %v2277_v49 = vmul.f32 -0.05, %v3002_v61  ;;  %v308_v52 = vmul.f32 1.442695, %v2276_v44 }
 0x115   :  { %420 = vrot.lane.b32.xlu0 %v2982_v41, %s2866_s24  ;;  %422 = vrot.lane.b32.xlu1 %v2994_v53, %s2866_s24  ;;  %2557 = vpow2.f32 %v330_v57  ;;  %v326_v0 = vmul.f32 1.442695, %v2285_v58  ;;  %v3019_v5 = vadd.f32 %v253_v56, %v165_v33  ;;  %v2298_v54 = vmul.f32 -1.442695, %v2977_v37 }
 0x116   :  { %v2406_v59 = vpop.f32.mrf.mxu0  ;;  %v2282_v55 = vmul.f32 -0.05, %v3011_v2  ;;  %v2288_v56 = vmul.f32 -1.442695, %v2984_v46  ;;  %v310_v36 = vmul.f32 1.442695, %v2277_v49 }
 0x117   :  { %v3006_v62 = vadd.f32 %v2406_v59, %v165_v33  ;;  %2559 = vpow2.f32 %v326_v0  ;;  %v2289_v58 = vmul.f32 -1.442695, %v3002_v61  ;;  %v2294_v59 = vmul.f32 -1.442695, %v3011_v2 }
 0x118   :  { %v256_v1 = vpop.f32.mrf.mxu0  ;;  %v320_v50 = vmul.f32 1.442695, %v2282_v55  ;;  %v2280_v60 = vmul.f32 -0.05, %v3019_v5  ;;  %v2296_v0 = vmul.f32 -1.442695, %v2982_v41 }
 0x119   :  { %406 = vrot.lane.b32.xlu0 %v3002_v61, %s2866_s24  ;;  %418 = vrot.lane.b32.xlu1 %v3006_v62, %s2866_s24  ;;  %v3015_v3 = vadd.f32 %v256_v1, %v165_v33  ;;  %v2283_v57 = vmul.f32 -0.05, %v3006_v62  ;;  %v2295_v46 = vmul.f32 -1.442695, %v3006_v62  ;;  %v2292_v62 = vmul.f32 -1.442695, %v3019_v5 }
 0x11a   :  { %v316_v1 = vmul.f32 1.442695, %v2280_v60  ;;  %v2297_v41 = vmul.f32 -1.442695, %v2994_v53 }
 0x11b   :  { %v2281_v63 = vmul.f32 -0.05, %v3015_v3 }
 0x11d   :  { %416 = vrot.lane.b32.xlu0 %v3011_v2, %s2866_s24  ;;  %414 = vrot.lane.b32.xlu1 %v3015_v3, %s2866_s24  ;;  %v318_v61 = vmul.f32 1.442695, %v2281_v63  ;;  %v3074_v2 = vpop.permute.xlu1 %548 }
 0x11e   :  { %v2554_v4 = vpop.eup %2553 }
 0x11f   :  { %v342_v6 = vadd.f32 1.0, %v2554_v4  ;;  %v2293_v4 = vmul.f32 -1.442695, %v3015_v3 }
 0x120   :  { %v2556_v8 = vpop.eup %2555 }
 0x121   :  { %412 = vrot.lane.b32.xlu0 %v3019_v5, %s2866_s24  ;;  %2561 = vrcp.f32 %v342_v6  ;;  %v340_v10 = vadd.f32 1.0, %v2556_v8  ;;  %566 = vrot.lane.b32.xlu1 %v98_v7, %s2865_s2 }
 0x122   :  { %v2558_v11 = vpop.eup %2557 }
 0x123   :  { %2563 = vrcp.f32 %v340_v10  ;;  %v343_v15 = vadd.f32 1.0, %v2558_v11 }
 0x124   :  { %v2560_v19 = vpop.eup %2559 }
 0x125   :  { %564 = vrot.lane.b32.xlu0 %v97_v9, %s2865_s2  ;;  %426 = vrot.lane.b32.xlu1 %v2990_v51, %s2866_s24  ;;  %2565 = vrcp.f32 %v343_v15  ;;  %v341_v23 = vadd.f32 1.0, %v2560_v19  ;;  %v3079_v19 = vpop.permute.xlu1 %550 }
 0x127   :  { %2567 = vrcp.f32 %v341_v23 }
 0x128   :  { %2569 = vpow2.f32 %v2290_v43 }
 0x129   :  { %424 = vrot.lane.b32.xlu0 %v2977_v37, %s2866_s24  ;;  %570 = vrot.lane.b32.xlu1 %v100_v16, %s2865_s2  ;;  %2571 = vpow2.f32 %v312_v45  ;;  %v322_v37 = vmul.f32 1.442695, %v2283_v57 }
 0x12a   :  { %2573 = vpow2.f32 %v314_v47 }
 0x12b   :  { %2575 = vpow2.f32 %v2291_v48 }
 0x12c   :  { %2577 = vpow2.f32 %v308_v52  ;;  %v555_v52 = vpop.permute.xlu1 %554 }
 0x12d   :  { %568 = vrot.lane.b32.xlu0 %v99_v21, %s2865_s2  ;;  %2579 = vpow2.f32 %v2298_v54  ;;  %v3081_v54 = vpop.permute.xlu0 %556 }
 0x12e   :  { %v3037_v24 = vpop.eup %2561  ;;  %2581 = vpow2.f32 %v2288_v56 }
 0x12f   :  { %v3040_v27 = vmul.f32 %v3037_v24, %v99_v21  ;;  %2583 = vpow2.f32 %v310_v36 }
 0x130   :  { %v3042_v29 = vpop.eup %2563  ;;  %2585 = vpow2.f32 %v2289_v58 }
 0x131   :  { %v3045_v33 = vmul.f32 %v3042_v29, %v97_v9  ;;  %2587 = vpow2.f32 %v320_v50 }
 0x132   :  { %v3047_v34 = vpop.eup %2565  ;;  %2589 = vpow2.f32 %v2294_v59 }
 0x133   :  { %v3050_v35 = vmul.f32 %v3047_v34, %v100_v16  ;;  %2591 = vpow2.f32 %v322_v37 }
 0x134   :  { %v3052_v38 = vpop.eup %2567  ;;  %2593 = vpow2.f32 %v2295_v46 }
 0x135   :  { %v3055_v39 = vmul.f32 %v3052_v38, %v98_v7  ;;  %v2570_v6 = vpop.eup %2569  ;;  %2595 = vpow2.f32 %v2296_v0  ;;  %v2299_v7 = vmul.f32 -1.442695, %v2990_v51 }
 0x136   :  { %v2572_v8 = vpop.eup %2571  ;;  %2597 = vpow2.f32 %v316_v1  ;;  %v502_v11 = vadd.f32 1.0, %v2570_v6  ;;  %v3083_v1 = vpop.permute.xlu1 %558 }
 0x137   :  { %v2574_v9 = vpop.eup %2573  ;;  %2599 = vpow2.f32 %v318_v61  ;;  %v334_v15 = vadd.f32 1.0, %v2572_v8  ;;  %v3085_v61 = vpop.permute.xlu0 %560 }
 0x138   :  { %v2576_v10 = vpop.eup %2575  ;;  %2601 = vpow2.f32 %v2293_v4  ;;  %v335_v16 = vadd.f32 1.0, %v2574_v9 }
 0x139   :  { %v2578_v12 = vpop.eup %2577  ;;  %2603 = vpow2.f32 %v2299_v7  ;;  %v503_v21 = vadd.f32 1.0, %v2576_v10 }
 0x13a   :  { %v2580_v3 = vpop.eup %2579  ;;  %2605 = vpow2.f32 %v2292_v62  ;;  %v332_v5 = vadd.f32 1.0, %v2578_v12 }
 0x13b   :  { %v2582_v51 = vpop.eup %2581  ;;  %2607 = vpow2.f32 %v2297_v41  ;;  %v510_v42 = vadd.f32 1.0, %v2580_v3 }
 0x13c   :  { %v2584_v23 = vpop.eup %2583  ;;  %2609 = vrcp.f32 %v502_v11  ;;  %v500_v44 = vadd.f32 1.0, %v2582_v51 }
 0x13d   :  { %v2586_v53 = vpop.eup %2585  ;;  %2611 = vrcp.f32 %v334_v15  ;;  %v333_v47 = vadd.f32 1.0, %v2584_v23 }
 0x13e   :  { %v2588_v43 = vpop.eup %2587  ;;  %2613 = vrcp.f32 %v335_v16  ;;  %v501_v49 = vadd.f32 1.0, %v2586_v53  ;;  %v3087_v16 = vpop.permute.xlu1 %562 }
 0x13f   :  { %v2590_v45 = vpop.eup %2589  ;;  %2615 = vrcp.f32 %v503_v21  ;;  %v338_v56 = vadd.f32 1.0, %v2588_v43 }
 0x140   :  { %v2592_v48 = vpop.eup %2591  ;;  %2617 = vrcp.f32 %v332_v5  ;;  %v506_v57 = vadd.f32 1.0, %v2590_v45 }
 0x141   :  { %v2594_v55 = vpop.eup %2593  ;;  %2619 = vrcp.f32 %v510_v42  ;;  %v339_v50 = vadd.f32 1.0, %v2592_v48 }
 0x142   :  { %v2596_v36 = vpop.eup %2595  ;;  %2621 = vrcp.f32 %v500_v44  ;;  %v507_v60 = vadd.f32 1.0, %v2594_v55 }
 0x143   :  { %v2598_v58 = vpop.eup %2597  ;;  %2623 = vrcp.f32 %v333_v47  ;;  %v508_v63 = vadd.f32 1.0, %v2596_v36 }
 0x144   :  { %v2600_v59 = vpop.eup %2599  ;;  %2625 = vrcp.f32 %v501_v49  ;;  %v336_v0 = vadd.f32 1.0, %v2598_v58 }
 0x145   :  { %v2602_v37 = vpop.eup %2601  ;;  %2627 = vrcp.f32 %v338_v56  ;;  %v337_v6 = vadd.f32 1.0, %v2600_v59 }
 0x146   :  { %v2604_v46 = vpop.eup %2603  ;;  %2629 = vrcp.f32 %v506_v57  ;;  %v505_v8 = vadd.f32 1.0, %v2602_v37  ;;  %v388_v57 = vsub.f32 1.0, %v3042_v29 }
 0x147   :  { %v2606_v4 = vpop.eup %2605  ;;  %2631 = vrcp.f32 %v339_v50  ;;  %v511_v9 = vadd.f32 1.0, %v2604_v46 }
 0x148   :  { %v2608_v7 = vpop.eup %2607  ;;  %2633 = vrcp.f32 %v507_v60  ;;  %v504_v10 = vadd.f32 1.0, %v2606_v4 }
 0x149   :  { %v2610_v62 = vpop.eup %2609  ;;  %2635 = vrcp.f32 %v508_v63  ;;  %v509_v15 = vadd.f32 1.0, %v2608_v7 }
 0x14a   :  { %v2612_v41 = vpop.eup %2611  ;;  %2637 = vrcp.f32 %v336_v0  ;;  %v586_v5 = vmul.f32 %v2610_v62, %v553_v40  ;;  %v598_v53 = vsub.f32 1.0, %v2610_v62 }
 0x14b   :  { %v2614_v12 = vpop.eup %2613  ;;  %2639 = vrcp.f32 %v337_v6  ;;  %v382_v21 = vsub.f32 1.0, %v2612_v41  ;;  %v370_v49 = vmul.f32 %v2612_v41, %v2929_v14  ;;  %v389_v14 = vsub.f32 1.0, %v3052_v38 }
 0x14c   :  { %v2616_v3 = vpop.eup %2615  ;;  %2641 = vrcp.f32 %v505_v8  ;;  %v383_v45 = vsub.f32 1.0, %v2614_v12  ;;  %v371_v59 = vmul.f32 %v2614_v12, %v2940_v22 }
 0x14d   :  { %v2618_v51 = vpop.eup %2617  ;;  %2643 = vrcp.f32 %v511_v9  ;;  %v599_v47 = vsub.f32 1.0, %v2616_v3  ;;  %v587_v50 = vmul.f32 %v2616_v3, %v555_v52 }
 0x14e   :  { %v3089_v23 = vpop.eup %2619  ;;  %2645 = vrcp.f32 %v504_v10  ;;  %v380_v56 = vsub.f32 1.0, %v2618_v51  ;;  %v368_v0 = vmul.f32 %v2618_v51, %v2927_v13 }
 0x14f   :  { %v2622_v43 = vpop.eup %2621  ;;  %2647 = vrcp.f32 %v509_v15 }
 0x150   :  { %v2624_v48 = vpop.eup %2623  ;;  %v584_v63 = vmul.f32 %v2622_v43, %v3074_v2  ;;  %v596_v46 = vsub.f32 1.0, %v2622_v43 }
 0x151   :  { %v2626_v58 = vpop.eup %2625  ;;  %v381_v41 = vsub.f32 1.0, %v2624_v48  ;;  %v369_v13 = vmul.f32 %v2624_v48, %v2934_v17 }
 0x152   :  { %v2628_v37 = vpop.eup %2627  ;;  %v597_v15 = vsub.f32 1.0, %v2626_v58  ;;  %v585_v51 = vmul.f32 %v2626_v58, %v3079_v19 }
 0x153   :  { %v2630_v6 = vpop.eup %2629  ;;  %v374_v43 = vmul.f32 %v2628_v37, %v2946_v25  ;;  %v386_v19 = vsub.f32 1.0, %v2628_v37 }
 0x154   :  { %v2632_v8 = vpop.eup %2631 }
 0x155   :  { %v2634_v10 = vpop.eup %2633 }
 0x156   :  { %v3113_v3 = vpop.eup %2635 }
 0x157   :  { %v2638_v17 = vpop.eup %2637 }
 0x158   :  { %v2640_v48 = vpop.eup %2639 }
 0x17f   :  { %v409_v11 = vpop.permute.xlu0 %408 }
 0x180   :  { %v442_v44 = vmul.f32 %v409_v11, %v382_v21  ;;  %v610_v55 = vmul.f32 %v598_v53, %v409_v11 }
 0x182   :  { %v3099_v7 = vadd.f32 %v442_v44, %v370_v49  ;;  %v622_v62 = vadd.f32 %v610_v55, %v586_v5  ;;  %v603_v55 = vsub.f32 1.0, %v2634_v10 }
 0x183   :  { %v405_v42 = vpop.permute.xlu0 %404  ;;  %v411_v36 = vpop.permute.xlu1 %410 }
 0x184   :  { %v443_v40 = vmul.f32 %v411_v36, %v383_v45  ;;  %v611_v60 = vmul.f32 %v599_v47, %v411_v36  ;;  %v440_v9 = vmul.f32 %v405_v42, %v380_v56  ;;  %v608_v21 = vmul.f32 %v596_v46, %v405_v42  ;;  %v2642_v36 = vpop.eup %2641 }
 0x185   :  { %v602_v42 = vsub.f32 1.0, %v2630_v6 }
 0x186   :  { %v3101_v29 = vadd.f32 %v443_v40, %v371_v59  ;;  %v623_v52 = vadd.f32 %v611_v60, %v587_v50  ;;  %v452_v49 = vadd.f32 %v440_v9, %v368_v0  ;;  %v3123_v50 = vpop.eup %2643  ;;  %v590_v59 = vmul.f32 %v2630_v6, %v3085_v61 }
 0x187   :  { %v3096_v4 = vpop.permute.xlu0 %420  ;;  %v3104_v2 = vpop.permute.xlu1 %422  ;;  %v620_v40 = vadd.f32 %v608_v21, %v584_v63  ;;  %v375_v60 = vmul.f32 %v2632_v8, %v2960_v28  ;;  %v601_v9 = vsub.f32 1.0, %v2642_v36  ;;  %v604_v28 = vsub.f32 1.0, %v3113_v3 }
 0x188   :  { %v448_v22 = vmul.f32 %v3096_v4, %v388_v57  ;;  %v633_v38 = vpack.c.bf16 %v3101_v29, %v3099_v7  ;;  %v449_v12 = vmul.f32 %v3104_v2, %v389_v14  ;;  %v1388_v5 = vpack.c.bf16 %v623_v52, %v622_v62  ;;  %v2646_v14 = vpop.eup %2645 }
 0x189   :  { %v385_v52 = vsub.f32 1.0, %v2640_v48  ;;  %v591_v62 = vmul.f32 %v2634_v10, %v3087_v16  ;;  %v373_v10 = vmul.f32 %v2640_v48, %v2951_v26  ;;  %v391_v26 = vsub.f32 1.0, %v3047_v34 }
 0x18a   :  { %v3110_v11 = vadd.f32 %v448_v22, %v3045_v33  ;;  %v3118_v44 = vadd.f32 %v449_v12, %v3055_v39  ;;  %v387_v33 = vsub.f32 1.0, %v2632_v8  ;;  %1405 = vrot.lane.b32.xlu1 %v1388_v5, %s2867_s25  ;;  %v2648_v22 = vpop.eup %2647  ;;  %v384_v12 = vsub.f32 1.0, %v2638_v17 }
 0x18b   :  { %v407_v53 = vpop.permute.xlu0 %406  ;;  %v419_v56 = vpop.permute.xlu1 %418  ;;  %v600_v5 = vsub.f32 1.0, %v2646_v14 }
 0x18c   :  { %v441_v45 = vmul.f32 %v407_v53, %v381_v41  ;;  %v609_v47 = vmul.f32 %v597_v15, %v407_v53  ;;  %v636_v25 = vpack.c.bf16 %v3118_v44, %v3110_v11  ;;  %v447_v39 = vmul.f32 %v419_v56, %v387_v33  ;;  %v2537_v15 = vld [vmem:[#allocation10 + $0x28] sm:$0xff]  }
 0x18d   :  { %v615_v46 = vmul.f32 %v603_v55, %v419_v56  ;;  %v589_v33 = vmul.f32 %v2642_v36, %v3083_v1 }
 0x18e   :  { %v453_v57 = vadd.f32 %v441_v45, %v369_v13  ;;  %v621_v58 = vadd.f32 %v609_v47, %v585_v51  ;;  %v459_v51 = vadd.f32 %v447_v39, %v375_v60  ;;  %v372_v45 = vmul.f32 %v2638_v17, %v2938_v20 }
 0x18f   :  { %v417_v0 = vpop.permute.xlu0 %416  ;;  %v415_v41 = vpop.permute.xlu1 %414  ;;  %v627_v8 = vadd.f32 %v615_v46, %v591_v62  ;;  %v588_v47 = vmul.f32 %v2646_v14, %v3081_v54  ;;  %v390_v46 = vsub.f32 1.0, %v3037_v24  ;;  %v607_v14 = vsub.f32 1.0, %v3123_v50 }
 0x190   :  { %v632_v7 = vpack.c.bf16 %v453_v57, %v452_v49  ;;  %v446_v37 = vmul.f32 %v417_v0, %v386_v19  ;;  %v614_v29 = vmul.f32 %v602_v42, %v417_v0  ;;  %v1387_v13 = vpack.c.bf16 %v621_v58, %v620_v40 }
 0x191   :  { %v445_v6 = vmul.f32 %v415_v41, %v385_v52  ;;  %v613_v21 = vmul.f32 %v601_v9, %v415_v41  ;;  %v605_v19 = vsub.f32 1.0, %v2648_v22 }
 0x192   :  { %v458_v61 = vadd.f32 %v446_v37, %v374_v43  ;;  %v626_v63 = vadd.f32 %v614_v29, %v590_v59  ;;  %2415 = vmatprep.mubr.msk.bf16.mxu1 %vm647_vm2, %v632_v7  ;;  %1403 = vrot.lane.b32.xlu0 %v1387_v13, %s2867_s25  ;;  %v606_v7 = vsub.f32 1.0, %v3089_v23 }
 0x193   :  { %v413_v53 = vpop.permute.xlu0 %412  ;;  %2416 = vmatmul.mubr.msk.bf16.vlgmr.msra.gmra.mxu1 %vm647_vm2, %v633_v38  ;;  %v567_v55 = vpop.permute.xlu1 %566  ;;  %v457_v42 = vadd.f32 %v445_v6, %v373_v10  ;;  %v625_v58 = vadd.f32 %v613_v21, %v589_v33  ;;  %v617_v54 = vmul.f32 %v605_v19, %v3104_v2 }
 0x194   :  { %v635_v16 = vpack.c.bf16 %v459_v51, %v458_v61  ;;  %v444_v43 = vmul.f32 %v413_v53, %v384_v12  ;;  %2428 = vmatpush3.bf16.msra.mxu1 %v3031_v18  ;;  %v612_v49 = vmul.f32 %v600_v5, %v413_v53  ;;  %v1390_v56 = vpack.c.bf16 %v627_v8, %v626_v63  ;;  %v2538_v12 = vld [vmem:[#allocation10 + $0x48] sm:$0xff]   ;;  %v2540_v51 = vld [vmem:[#allocation10 + $0x38] sm:$0xff]  }
 0x195   :  { %2429 = vmatprep.subr.bf16.mxu1 %v2537_v15  ;;  %v593_v38 = vmul.f32 %v2648_v22, %v567_v55  ;;  %v616_v18 = vmul.f32 %v604_v28, %v3096_v4  ;;  %2443 = vmatprep.subr.bf16.mxu0 %v2538_v12 }
 0x196   :  { %v456_v57 = vadd.f32 %v444_v43, %v372_v45  ;;  %v624_v39 = vadd.f32 %v612_v49, %v588_v47  ;;  %1409 = vrot.lane.b32.xlu1 %v1390_v56, %s2867_s25  ;;  %2444 = vmatpush3.bf16.msra.mxu0 %v2538_v12  ;;  %v989_v43 = vsub.s32 2, %v2964_v30 }
 0x197   :  { %v565_v20 = vpop.permute.xlu0 %564  ;;  %v427_v48 = vpop.permute.xlu1 %426  ;;  %v629_v59 = vadd.f32 %v617_v54, %v593_v38 }
 0x198   :  { %v634_v1 = vpack.c.bf16 %v457_v42, %v456_v57  ;;  %v592_v17 = vmul.f32 %v3113_v3, %v565_v20  ;;  %2430 = vmatpush3.bf16.msra.mxu1 %v2537_v15  ;;  %v1389_v36 = vpack.c.bf16 %v625_v58, %v624_v39  ;;  %v451_v60 = vmul.f32 %v427_v48, %v391_v26  ;;  %v2539_v15 = vld [vmem:[#allocation10 + $0x40] sm:$0xff]  }
 0x199   :  { %2445 = vmatprep.subr.bf16.mxu0 %v2539_v15  ;;  %v1396_v49 = vrot.slane %v2970_v32, %v989_v43 }
 0x19a   :  { %v628_v40 = vadd.f32 %v616_v18, %v592_v17  ;;  %2419 = vmatprep.mubr.msk.bf16.mxu1 %vm647_vm2, %v634_v1  ;;  %1407 = vrot.lane.b32.xlu0 %v1389_v36, %s2867_s25  ;;  %v463_v4 = vadd.f32 %v451_v60, %v3050_v35  ;;  %v619_v35 = vmul.f32 %v607_v14, %v427_v48 }
 0x19b   :  { %v425_v34 = vpop.permute.xlu0 %424  ;;  %2420 = vmatmul.mubr.msk.bf16.gmra.mxu1 %vm647_vm2, %v635_v16  ;;  %v571_v0 = vpop.permute.xlu1 %570  ;;  %2446 = vmatpush3.bf16.msra.mxu0 %v2539_v15 }
 0x19c   :  { %v450_v2 = vmul.f32 %v425_v34, %v390_v46  ;;  %2423 = vmatprep.mubr.msk.bf16.mxu1 %vm647_vm2, %v636_v25  ;;  %v1391_v3 = vpack.c.bf16 %v629_v59, %v628_v40  ;;  %v595_v37 = vmul.f32 %v3123_v50, %v571_v0  ;;  %v618_v52 = vmul.f32 %v606_v7, %v425_v34 }
 0x19d   :  { %2447 = vmatprep.subr.bf16.mxu0 %v2540_v51 }
 0x19e   :  { %v462_v24 = vadd.f32 %v450_v2, %v3040_v27  ;;  %1411 = vrot.lane.b32.xlu0 %v1391_v3, %s2867_s25  ;;  %v631_v44 = vadd.f32 %v619_v35, %v595_v37 }
 0x19f   :  { %v569_v29 = vpop.permute.xlu0 %568  ;;  %2448 = vmatpush3.bf16.msra.mxu0 %v2540_v51 }
 0x1a0   :  { %v637_v22 = vpack.c.bf16 %v463_v4, %v462_v24  ;;  %v594_v11 = vmul.f32 %v3089_v23, %v569_v29 }
 0x1a2   :  { %v630_v25 = vadd.f32 %v618_v52, %v594_v11 }
 0x1a3   :  { %2424 = vmatmul.mubr.msk.bf16.gmra.mxu1 %vm647_vm2, %v637_v22 }
 0x1a4   :  { %v1392_v62 = vpack.c.bf16 %v631_v44, %v630_v25 }
 0x1a6   :  { %1413 = vrot.lane.b32.xlu1 %v1392_v62, %s2867_s25 }
 0x1fc   :  { %v1406_v41 = vpop.permute.xlu1 %1405 }
 0x204   :  { %v1404_v9 = vpop.permute.xlu0 %1403 }
 0x205   :  { %2431 = vmatprep.mubr.msk.bf16.mxu1 %vm647_vm2, %v1404_v9 }
 0x206   :  { %2432 = vmatmul.mubr.msk.bf16.vlgmr.msra.gmra.mxu1 %vm647_vm2, %v1406_v41 }
 0x208   :  { %v1410_v50 = vpop.permute.xlu1 %1409 }
 0x20c   :  { %v1408_v27 = vpop.permute.xlu0 %1407 }
 0x20d   :  { %2435 = vmatprep.mubr.msk.bf16.mxu1 %vm647_vm2, %v1408_v27 }
 0x20e   :  { %2436 = vmatmul.mubr.msk.bf16.gmra.mxu1 %vm647_vm2, %v1410_v50  ;;  %v2868_v50 = vmov 0  }
 0x20f   :  { %2530 = vset.pattern.permute.xlu0 %v2868_v50  ;;  %2529 = vset.pattern.permute.xlu1 %v2868_v50 }
 0x210   :  { %v1412_v23 = vpop.permute.xlu0 %1411 }
 0x211   :  { %2439 = vmatprep.mubr.msk.bf16.mxu1 %vm647_vm2, %v1412_v23 }
 0x218   :  { %v1414_v13 = vpop.permute.xlu1 %1413 }
 0x219   :  { %2440 = vmatmul.mubr.msk.bf16.gmra.mxu1 %vm647_vm2, %v1414_v13 }
 0x253   :  { %v3165_v61 = vpop.f32.mrf.mxu1 }
 0x255   :  { %v3167_v63 = vpop.f32.mrf.mxu1 }
 0x257   :  { %v3169_v6 = vpop.f32.mrf.mxu1 }
 0x259   :  { %v3171_v28 = vpop.f32.mrf.mxu1 }
 0x25b   :  { %v3173_v8 = vpop.f32.mrf.mxu1 }
 0x25d   :  { %v3175_v21 = vpop.f32.mrf.mxu1 }
 0x25f   :  { %v3177_v5 = vpop.f32.mrf.mxu1 }
 0x261   :  { %v3179_v53 = vpop.f32.mrf.mxu1 }
 0x263   :  { %v3181_v16 = vpop.f32.mrf.mxu1 }
 0x265   :  { %v3183_v10 = vpop.f32.mrf.mxu1 }
 0x267   :  { %v3185_v45 = vpop.f32.mrf.mxu1 }
 0x269   :  { %v3188_v47 = vpop.f32.mrf.mxu1 }
 0x2c6   :  { %v2433_v33 = vpop.f32.mrf.mxu1 }
 0x2c7   :  { %v1488_v57 = vadd.f32 %v2433_v33, %v1396_v49 }
 0x2c8   :  { %v1479_v55 = vpop.f32.mrf.mxu1 }
 0x2c9   :  { %v1480_v56 = vadd.f32 %v1479_v55, %v1396_v49 }
 0x2ca   :  { %v2434_v19 = vpop.f32.mrf.mxu1 }
 0x2cb   :  { %v1491_v42 = vadd.f32 %v2434_v19, %v1396_v49  ;;  %2649 = vtanh.f32 %v1480_v56 }
 0x2cc   :  { %v1482_v38 = vpop.f32.mrf.mxu1 }
 0x2cd   :  { %v1483_v58 = vadd.f32 %v1482_v38, %v1396_v49  ;;  %2651 = vtanh.f32 %v1491_v42 }
 0x2ce   :  { %v2437_v39 = vpop.f32.mrf.mxu1 }
 0x2cf   :  { %2653 = vtanh.f32 %v1483_v58  ;;  %v1504_v1 = vadd.f32 %v2437_v39, %v1396_v49 }
 0x2d0   :  { %2655 = vtanh.f32 %v1488_v57  ;;  %v1495_v20 = vpop.f32.mrf.mxu1 }
 0x2d1   :  { %v1496_v26 = vadd.f32 %v1495_v20, %v1396_v49 }
 0x2d2   :  { %v2438_v18 = vpop.f32.mrf.mxu1 }
 0x2d3   :  { %v1507_v54 = vadd.f32 %v2438_v18, %v1396_v49  ;;  %2657 = vtanh.f32 %v1496_v26 }
 0x2d4   :  { %v1498_v17 = vpop.f32.mrf.mxu1 }
 0x2d5   :  { %v1499_v32 = vadd.f32 %v1498_v17, %v1396_v49  ;;  %2659 = vtanh.f32 %v1507_v54 }
 0x2d7   :  { %2661 = vtanh.f32 %v1499_v32 }
 0x2d8   :  { %2663 = vtanh.f32 %v1504_v1  ;;  %v2650_v36 = vpop.eup %2649 }
 0x2d9   :  { %v2441_v48 = vpop.f32.mrf.mxu1 }
 0x2da   :  { %v2652_v40 = vpop.eup %2651  ;;  %v1520_v14 = vadd.f32 %v2441_v48, %v1396_v49 }
 0x2db   :  { %v1511_v59 = vpop.f32.mrf.mxu1 }
 0x2dc   :  { %v1512_v60 = vadd.f32 %v1511_v59, %v1396_v49  ;;  %v2654_v46 = vpop.eup %2653 }
 0x2dd   :  { %v2442_v34 = vpop.f32.mrf.mxu1  ;;  %v2656_v4 = vpop.eup %2655  ;;  %v1538_v3 = vpack.c.bf16 %v2654_v46, %v2650_v36 }
 0x2de   :  { %v1523_v2 = vadd.f32 %v2442_v34, %v1396_v49  ;;  %v1539_v0 = vpack.c.bf16 %v2652_v40, %v2656_v4  ;;  %2665 = vtanh.f32 %v1512_v60 }
 0x2df   :  { %v1514_v7 = vpop.f32.mrf.mxu1  ;;  %2449 = vmatprep.mubr.msk.bf16.mxu0 %vm184_vm0, %v1538_v3 }
 0x2e0   :  { %v1515_v24 = vadd.f32 %v1514_v7, %v1396_v49  ;;  %2667 = vtanh.f32 %v1523_v2  ;;  %2450 = vmatmul.mubr.msk.bf16.vlgmr.msra.gmra.mxu0 %vm184_vm0, %v1539_v0  ;;  %v2658_v37 = vpop.eup %2657 }
 0x2e2   :  { %2669 = vtanh.f32 %v1515_v24  ;;  %v2660_v29 = vpop.eup %2659 }
 0x2e3   :  { %2671 = vtanh.f32 %v1520_v14 }
 0x2e4   :  { %v2662_v35 = vpop.eup %2661 }
 0x2e5   :  { %v2664_v52 = vpop.eup %2663  ;;  %v1540_v22 = vpack.c.bf16 %v2662_v35, %v2658_v37 }
 0x2e6   :  { %v1541_v11 = vpack.c.bf16 %v2660_v29, %v2664_v52 }
 0x2e7   :  { %2453 = vmatprep.mubr.msk.bf16.mxu0 %vm184_vm0, %v1540_v22 }
 0x2e8   :  { %2454 = vmatmul.mubr.msk.bf16.gmra.mxu0 %vm184_vm0, %v1541_v11 }
 0x2eb   :  { %v2666_v44 = vpop.eup %2665 }
 0x2ed   :  { %v2668_v25 = vpop.eup %2667 }
 0x2ef   :  { %v2670_v62 = vpop.eup %2669 }
 0x2f0   :  { %v2672_v9 = vpop.eup %2671  ;;  %v1542_v41 = vpack.c.bf16 %v2670_v62, %v2666_v44 }
 0x2f1   :  { %v1543_v27 = vpack.c.bf16 %v2668_v25, %v2672_v9 }
 0x2f2   :  { %2457 = vmatprep.mubr.msk.bf16.mxu0 %vm184_vm0, %v1542_v41 }
 0x2f3   :  { %2458 = vmatmul.mubr.msk.bf16.gmra.mxu0 %vm184_vm0, %v1543_v27 }
 0x3a0   :  { %v2451_v23 = vpop.f32.mrf.mxu0 }
 0x3a1   :  { %v1671_v15 = vsel %vm1661_vm3, %v2451_v23, -inf }
 0x3a2   :  { %v1614_v13 = vpop.f32.mrf.mxu0 }
 0x3a3   :  { %v1662_v55 = vsel %vm1661_vm3, %v1614_v13, -inf }
 0x3a4   :  { %v2452_v12 = vpop.f32.mrf.mxu0 }
 0x3a5   :  { %v1672_v51 = vsel %vm1661_vm3, %v2452_v12, -inf }
 0x3a6   :  { %v1673_v33 = vmax.f32 %v1671_v15, %v1672_v51  ;;  %v1617_v49 = vpop.f32.mrf.mxu0 }
 0x3a7   :  { %v1663_v56 = vsel %vm1661_vm3, %v1617_v49, -inf }
 0x3a8   :  { %v1674_v19 = vrot.slane %v1673_v33, 4  ;;  %v1664_v42 = vmax.f32 %v1662_v55, %v1663_v56  ;;  %v2455_v57 = vpop.f32.mrf.mxu0 }
 0x3a9   :  { %v1689_v54 = vsel %vm1661_vm3, %v2455_v57, -inf }
 0x3aa   :  { %v1675_v38 = vmax.f32 %v1673_v33, %v1674_v19  ;;  %v1665_v58 = vrot.slane %v1664_v42, 4  ;;  %v3203_v39 = vpop.f32.mrf.mxu0 }
 0x3ab   :  { %v1680_v59 = vsel %vm1661_vm3, %v3203_v39, -inf }
 0x3ac   :  { %v1676_v20 = vrot.slane %v1675_v38, 2  ;;  %v1666_v26 = vmax.f32 %v1664_v42, %v1665_v58  ;;  %v2456_v18 = vpop.f32.mrf.mxu0 }
 0x3ad   :  { %v1690_v1 = vsel %vm1661_vm3, %v2456_v18, -inf }
 0x3ae   :  { %v1677_v17 = vmax.f32 %v1675_v38, %v1676_v20  ;;  %v1667_v32 = vrot.slane %v1666_v26, 2  ;;  %v1691_v48 = vmax.f32 %v1689_v54, %v1690_v1  ;;  %v1633_v36 = vpop.f32.mrf.mxu0 }
 0x3af   :  { %v1681_v40 = vsel %vm1661_vm3, %v1633_v36, -inf }
 0x3b0   :  { %v1678_v60 = vrot.slane %v1677_v17, 1  ;;  %v1668_v46 = vmax.f32 %v1666_v26, %v1667_v32  ;;  %v1692_v34 = vrot.slane %v1691_v48, 4  ;;  %v1682_v4 = vmax.f32 %v1680_v59, %v1681_v40 }
 0x3b2   :  { %v1679_v2 = vmax.f32 %v1677_v17, %v1678_v60  ;;  %v1669_v3 = vrot.slane %v1668_v46, 1  ;;  %v1693_v0 = vmax.f32 %v1691_v48, %v1692_v34  ;;  %v1683_v14 = vrot.slane %v1682_v4, 4 }
 0x3b3   :  { %v3210_v7 = vpop.f32.mrf.mxu0 }
 0x3b4   :  { %v1718_v24 = vsub.f32 %v2451_v23, %v1679_v2  ;;  %v1719_v37 = vsub.f32 %v2452_v12, %v1679_v2  ;;  %v1670_v29 = vmax.f32 %v1668_v46, %v1669_v3  ;;  %v1694_v35 = vrot.slane %v1693_v0, 2 }
 0x3b5   :  { %v3212_v52 = vpop.f32.mrf.mxu0  ;;  %v1684_v22 = vmax.f32 %v1682_v4, %v1683_v14  ;;  %v1707_v11 = vsel %vm1661_vm3, %v3210_v7, -inf }
 0x3b6   :  { %v1732_v44 = vmul.f32 1.442695, %v1718_v24  ;;  %v1734_v25 = vmul.f32 1.442695, %v1719_v37  ;;  %v1716_v62 = vsub.f32 %v1614_v13, %v1670_v29  ;;  %v1717_v9 = vsub.f32 %v1617_v49, %v1670_v29 }
 0x3b7   :  { %v2460_v41 = vpop.f32.mrf.mxu0  ;;  %v1695_v27 = vmax.f32 %v1693_v0, %v1694_v35  ;;  %v1685_v50 = vrot.slane %v1684_v22, 2  ;;  %v1698_v15 = vsel %vm1661_vm3, %v3212_v52, -inf }
 0x3b8   :  { %v1708_v23 = vsel %vm1661_vm3, %v2460_v41, -inf  ;;  %2673 = vpow2.f32 %v1732_v44  ;;  %v1728_v12 = vmul.f32 1.442695, %v1716_v62  ;;  %v1730_v51 = vmul.f32 1.442695, %v1717_v9 }
 0x3b9   :  { %v1709_v33 = vmax.f32 %v1707_v11, %v1708_v23  ;;  %v1649_v55 = vpop.f32.mrf.mxu0  ;;  %2675 = vpow2.f32 %v1734_v25  ;;  %v1696_v56 = vrot.slane %v1695_v27, 1  ;;  %v1686_v19 = vmax.f32 %v1684_v22, %v1685_v50 }
 0x3ba   :  { %v1699_v42 = vsel %vm1661_vm3, %v1649_v55, -inf  ;;  %2677 = vpow2.f32 %v1728_v12 }
 0x3bb   :  { %v1710_v13 = vrot.slane %v1709_v33, 4  ;;  %v1700_v49 = vmax.f32 %v1698_v15, %v1699_v42  ;;  %2679 = vpow2.f32 %v1730_v51  ;;  %v1697_v38 = vmax.f32 %v1695_v27, %v1696_v56 }
 0x3bc   :  { %v1687_v58 = vrot.slane %v1686_v19, 1 }
 0x3bd   :  { %v1711_v20 = vmax.f32 %v1709_v33, %v1710_v13  ;;  %v1701_v26 = vrot.slane %v1700_v49, 4  ;;  %v1722_v54 = vsub.f32 %v2455_v57, %v1697_v38  ;;  %v1723_v1 = vsub.f32 %v2456_v18, %v1697_v38 }
 0x3be   :  { %v1688_v17 = vmax.f32 %v1686_v19, %v1687_v58 }
 0x3bf   :  { %v1712_v32 = vrot.slane %v1711_v20, 2  ;;  %v1702_v48 = vmax.f32 %v1700_v49, %v1701_v26  ;;  %v1740_v59 = vmul.f32 1.442695, %v1722_v54  ;;  %v1742_v40 = vmul.f32 1.442695, %v1723_v1 }
 0x3c0   :  { %v1720_v60 = vsub.f32 %v3203_v39, %v1688_v17  ;;  %v1721_v46 = vsub.f32 %v1633_v36, %v1688_v17 }
 0x3c1   :  { %v1713_v34 = vmax.f32 %v1711_v20, %v1712_v32  ;;  %v1703_v4 = vrot.slane %v1702_v48, 2  ;;  %2681 = vpow2.f32 %v1740_v59 }
 0x3c2   :  { %v1736_v2 = vmul.f32 1.442695, %v1720_v60  ;;  %v1738_v3 = vmul.f32 1.442695, %v1721_v46  ;;  %2683 = vpow2.f32 %v1742_v40 }
 0x3c3   :  { %v1714_v0 = vrot.slane %v1713_v34, 1  ;;  %v1704_v14 = vmax.f32 %v1702_v48, %v1703_v4 }
 0x3c4   :  { %2685 = vpow2.f32 %v1736_v2 }
 0x3c5   :  { %2687 = vpow2.f32 %v1738_v3  ;;  %v1715_v57 = vmax.f32 %v1713_v34, %v1714_v0  ;;  %v1705_v18 = vrot.slane %v1704_v14, 1  ;;  %v3221_v24 = vpop.eup %2673 }
 0x3c6   :  { %v3223_v37 = vpop.eup %2675  ;;  %v1761_v39 = vsel %vm1661_vm3, %v3221_v24, 0.0 }
 0x3c7   :  { %v1726_v36 = vsub.f32 %v3210_v7, %v1715_v57  ;;  %v1727_v29 = vsub.f32 %v2460_v41, %v1715_v57  ;;  %v1706_v35 = vmax.f32 %v1704_v14, %v1705_v18  ;;  %v3228_v22 = vpop.eup %2677  ;;  %v1762_v11 = vsel %vm1661_vm3, %v3223_v37, 0.0 }
 0x3c8   :  { %v3232_v44 = vpop.eup %2679  ;;  %v1763_v25 = vadd.f32 %v1762_v11, %v1761_v39  ;;  %v1752_v62 = vsel %vm1661_vm3, %v3228_v22, 0.0 }
 0x3c9   :  { %v1748_v9 = vmul.f32 1.442695, %v1726_v36  ;;  %v1750_v27 = vmul.f32 1.442695, %v1727_v29  ;;  %v1753_v50 = vsel %vm1661_vm3, %v3232_v44, 0.0  ;;  %v1724_v7 = vsub.f32 %v3212_v52, %v1706_v35 }
 0x3ca   :  { %v1725_v41 = vsub.f32 %v1649_v55, %v1706_v35  ;;  %v1764_v15 = vrot.slane %v1763_v25, 4  ;;  %v1754_v23 = vadd.f32 %v1753_v50, %v1752_v62 }
 0x3cb   :  { %2689 = vpow2.f32 %v1748_v9  ;;  %v1744_v12 = vmul.f32 1.442695, %v1724_v7 }
 0x3cc   :  { %2691 = vpow2.f32 %v1750_v27  ;;  %v1746_v51 = vmul.f32 1.442695, %v1725_v41  ;;  %v1765_v33 = vadd.f32 %v1764_v15, %v1763_v25  ;;  %v1755_v56 = vrot.slane %v1754_v23, 4 }
 0x3cd   :  { %2693 = vpow2.f32 %v1744_v12 }
 0x3ce   :  { %v3239_v19 = vpop.eup %2681  ;;  %v1766_v42 = vrot.slane %v1765_v33, 2  ;;  %v1756_v13 = vadd.f32 %v1755_v56, %v1754_v23  ;;  %2695 = vpow2.f32 %v1746_v51 }
 0x3cf   :  { %v3241_v49 = vpop.eup %2683  ;;  %v1779_v52 = vsel %vm1661_vm3, %v3239_v19, 0.0 }
 0x3d0   :  { %v1757_v38 = vrot.slane %v1756_v13, 2  ;;  %v1780_v58 = vsel %vm1661_vm3, %v3241_v49, 0.0  ;;  %v1767_v20 = vadd.f32 %v1766_v42, %v1765_v33 }
 0x3d1   :  { %v3245_v55 = vpop.eup %2685  ;;  %v1781_v54 = vadd.f32 %v1780_v58, %v1779_v52 }
 0x3d2   :  { %v3249_v26 = vpop.eup %2687  ;;  %v1770_v1 = vsel %vm1661_vm3, %v3245_v55, 0.0  ;;  %v1768_v32 = vrot.slane %v1767_v20, 1  ;;  %v1758_v48 = vadd.f32 %v1757_v38, %v1756_v13 }
 0x3d3   :  { %v1771_v17 = vsel %vm1661_vm3, %v3249_v26, 0.0  ;;  %v1782_v59 = vrot.slane %v1781_v54, 4 }
 0x3d4   :  { %v1772_v40 = vadd.f32 %v1771_v17, %v1770_v1  ;;  %v1769_v60 = vadd.f32 %v1768_v32, %v1767_v20  ;;  %v1759_v46 = vrot.slane %v1758_v48, 1 }
 0x3d5   :  { %v1783_v34 = vadd.f32 %v1782_v59, %v1781_v54 }
 0x3d6   :  { %v1773_v4 = vrot.slane %v1772_v40, 4  ;;  %2697 = vrcp.f32 %v1769_v60  ;;  %v1760_v2 = vadd.f32 %v1759_v46, %v1758_v48 }
 0x3d7   :  { %v1784_v0 = vrot.slane %v1783_v34, 2 }
 0x3d8   :  { %v3255_v3 = vpop.eup %2689  ;;  %v1774_v14 = vadd.f32 %v1773_v4, %v1772_v40  ;;  %2699 = vrcp.f32 %v1760_v2 }
 0x3d9   :  { %v2692_v57 = vpop.eup %2691  ;;  %v1797_v18 = vsel %vm1661_vm3, %v3255_v3, 0.0  ;;  %v1785_v29 = vadd.f32 %v1784_v0, %v1783_v34 }
 0x3da   :  { %v1775_v39 = vrot.slane %v1774_v14, 2  ;;  %v1798_v36 = vsel %vm1661_vm3, %v2692_v57, 0.0  ;;  %v2694_v35 = vpop.eup %2693 }
 0x3db   :  { %v1799_v11 = vadd.f32 %v1798_v36, %v1797_v18  ;;  %v2696_v25 = vpop.eup %2695  ;;  %v1788_v62 = vsel %vm1661_vm3, %v2694_v35, 0.0  ;;  %v1786_v9 = vrot.slane %v1785_v29, 1  ;;  %v950_v36 = vsub.s32 1, %v2964_v30 }
 0x3dc   :  { %v1776_v27 = vadd.f32 %v1775_v39, %v1774_v14  ;;  %v1789_v7 = vsel %vm1661_vm3, %v2696_v25, 0.0 }
 0x3dd   :  { %v1800_v50 = vrot.slane %v1799_v11, 4  ;;  %v1790_v41 = vadd.f32 %v1789_v7, %v1788_v62  ;;  %v1787_v15 = vadd.f32 %v1786_v9, %v1785_v29  ;;  %v1022_v9 = vsub.s32 5, %v2964_v30  ;;  %v2715_v7 = vld [vmem:[#allocation5 + $0x18] sm:$0xff] }
 0x3de   :  { %v1777_v23 = vrot.slane %v1776_v27, 1 }
 0x3df   :  { %v1801_v12 = vadd.f32 %v1800_v50, %v1799_v11  ;;  %v1791_v51 = vrot.slane %v1790_v41, 4  ;;  %2701 = vrcp.f32 %v1787_v15  ;;  %v1000_v11 = vsub.s32 3, %v2964_v30  ;;  %v2716_v15 = vld [vmem:[#allocation5 + $0x10] sm:$0xff] }
 0x3e0   :  { %v1778_v33 = vadd.f32 %v1777_v23, %v1776_v27 }
 0x3e1   :  { %v1802_v56 = vrot.slane %v1801_v12, 2  ;;  %v1792_v42 = vadd.f32 %v1791_v51, %v1790_v41 }
 0x3e2   :  { %2703 = vrcp.f32 %v1778_v33 }
 0x3e3   :  { %v1803_v13 = vadd.f32 %v1802_v56, %v1801_v12  ;;  %v2698_v52 = vpop.eup %2697  ;;  %v1793_v38 = vrot.slane %v1792_v42, 2 }
 0x3e4   :  { %v1815_v58 = vmul.f32 %v2698_v52, %v3223_v37  ;;  %v1814_v20 = vmul.f32 %v2698_v52, %v3221_v24  ;;  %v2718_v52 = vld [vmem:[#allocation5] sm:$0xff] }
 0x3e5   :  { %v2700_v54 = vpop.eup %2699  ;;  %v1794_v1 = vadd.f32 %v1793_v38, %v1792_v42  ;;  %v1804_v17 = vrot.slane %v1803_v13, 1  ;;  %v2717_v42 = vld [vmem:[#allocation5 + $0x8] sm:$0xff] }
 0x3e6   :  { %1841 = vperm.xlu0 %2530, %v1815_v58   ;;  %1836 = vperm.xlu1 %2529, %v1814_v20   ;;  %v1813_v48 = vmul.f32 %v2700_v54, %v3232_v44  ;;  %v1812_v59 = vmul.f32 %v2700_v54, %v3228_v22 }
 0x3e7   :  { %v1795_v32 = vrot.slane %v1794_v1, 1  ;;  %v1805_v60 = vadd.f32 %v1804_v17, %v1803_v13 }
 0x3e9   :  { %v1796_v40 = vadd.f32 %v1795_v32, %v1794_v1 }
 0x3ea   :  { %1831 = vperm.xlu1 %2529, %v1813_v48   ;;  %1826 = vperm.xlu0 %2530, %v1812_v59   ;;  %v2719_v59 = vld [vmem:[#allocation5 + $0x38] sm:$0xff] }
 0x3eb   :  { %2705 = vrcp.f32 %v1796_v40 }
 0x3ec   :  { %v2702_v46 = vpop.eup %2701  ;;  %2707 = vrcp.f32 %v1805_v60  ;;  %v2720_v60 = vld [vmem:[#allocation5 + $0x30] sm:$0xff] }
 0x3ed   :  { %v1819_v37 = vmul.f32 %v2702_v46, %v3241_v49  ;;  %v1818_v24 = vmul.f32 %v2702_v46, %v3239_v19  ;;  %v2541_v19 = vld [vmem:[#allocation10 + $0x60] sm:$0xff]  }
 0x3ef   :  { %v2704_v34 = vpop.eup %2703  ;;  %1861 = vperm.xlu0 %2530, %v1819_v37   ;;  %1856 = vperm.xlu1 %2529, %v1818_v24  }
 0x3f0   :  { %v1817_v4 = vmul.f32 %v2704_v34, %v3249_v26  ;;  %v1816_v44 = vmul.f32 %v2704_v34, %v3245_v55  ;;  %v2870_v55 = vmov 0.0   ;;  %v2542_v26 = vld [vmem:[#allocation10 + $0x58] sm:$0xff]  }
 0x3f1   :  { %2461 = vmatprep.subr.bf16.mxu1 %v2870_v55  ;;  %2471 = vmatprep.subr.bf16.mxu0 %v2870_v55 }
 0x3f2   :  { %2462 = vmatpush3.bf16.msra.mxu1 %v2541_v19  ;;  %2467 = vmatprep.mubr.msk.bf16.mxu1 %vm2871_vm4, %v2870_v55 }
 0x3f3   :  { %1851 = vperm.xlu0 %2530, %v1817_v4   ;;  %1846 = vperm.xlu1 %2529, %v1816_v44  }
 0x3f4   :  { %2463 = vmatprep.subr.bf16.mxu1 %v2870_v55  ;;  %2477 = vmatprep.mubr.msk.bf16.mxu0 %vm2871_vm4, %v2870_v55 }
 0x3f6   :  { %2464 = vmatpush3.bf16.msra.mxu1 %v2542_v26 }
 0x3f7   :  { %2465 = vmatprep.subr.bf16.mxu1 %v2870_v55 }
 0x3f8   :  { %v2706_v22 = vpop.eup %2705 }
 0x3f9   :  { %v1821_v2 = vmul.f32 %v2706_v22, %v2696_v25  ;;  %v1820_v0 = vmul.f32 %v2706_v22, %v2694_v35  ;;  %v2708_v14 = vpop.eup %2707 }
 0x3fa   :  { %v1823_v18 = vmul.f32 %v2708_v14, %v2692_v57  ;;  %v1822_v49 = vmul.f32 %v2708_v14, %v3255_v3  ;;  %v2543_v3 = vld [vmem:[#allocation10 + $0x50] sm:$0xff]  }
 0x3fb   :  { %1871 = vperm.xlu0 %2530, %v1821_v2   ;;  %1866 = vperm.xlu1 %2529, %v1820_v0   ;;  %v964_v57 = vld [vmem:[#allocation7] sm:$0x3f]  ;;  %v2721_v0 = vld [vmem:[#allocation5 + $0x28] sm:$0xff] }
 0x3fc   :  { %2466 = vmatpush3.bf16.msra.mxu1 %v2543_v3  ;;  %v968_v39 = vrot.slane %v964_v57, %v164_v31  ;;  %v979_v29 = vrot.slane %v964_v57, %v950_v36  ;;  %v990_v35 = vrot.slane %v964_v57, %v989_v43  ;;  %v1001_v25 = vrot.slane %v964_v57, %v1000_v11 }
 0x3fd   :  { %2481 = vmatprep.subr.bf16.mxu1 %v2870_v55  ;;  %v1011_v31 = vsub.s32 4, %v2964_v30  ;;  %v1023_v43 = vrot.slane %v964_v57, %v1022_v9 }
 0x3ff   :  { %1881 = vperm.xlu0 %2530, %v1823_v18   ;;  %1876 = vperm.xlu1 %2529, %v1822_v49   ;;  %v1012_v62 = vrot.slane %v964_v57, %v1011_v31  ;;  %v2722_v18 = vld [vmem:[#allocation5 + $0x20] sm:$0xff] }
 0x403   :  { %863 = vrot.lane.b32.xlu0 %v3165_v61, %s2863_s0  ;;  %861 = vrot.lane.b32.xlu1 %v3171_v28, %s2863_s0 }
 0x407   :  { %867 = vrot.lane.b32.xlu0 %v3175_v21, %s2863_s0  ;;  %865 = vrot.lane.b32.xlu1 %v3169_v6, %s2863_s0 }
 0x40b   :  { %869 = vrot.lane.b32.xlu0 %v3179_v53, %s2863_s0  ;;  %859 = vrot.lane.b32.xlu1 %v3167_v63, %s2863_s0 }
 0x40f   :  { %809 = vrot.lane.b32.xlu0 %v3167_v63, %s2869_s26  ;;  %871 = vrot.lane.b32.xlu1 %v3173_v8, %s2863_s0 }
 0x413   :  { %813 = vrot.lane.b32.xlu0 %v3165_v61, %s2869_s26  ;;  %811 = vrot.lane.b32.xlu1 %v3171_v28, %s2869_s26 }
 0x417   :  { %873 = vrot.lane.b32.xlu0 %v3177_v5, %s2863_s0  ;;  %815 = vrot.lane.b32.xlu1 %v3169_v6, %s2869_s26 }
 0x41b   :  { %817 = vrot.lane.b32.xlu0 %v3175_v21, %s2869_s26  ;;  %875 = vrot.lane.b32.xlu1 %v3183_v10, %s2863_s0 }
 0x41f   :  { %877 = vrot.lane.b32.xlu0 %v3188_v47, %s2863_s0  ;;  %819 = vrot.lane.b32.xlu1 %v3179_v53, %s2869_s26 }
 0x423   :  { %821 = vrot.lane.b32.xlu0 %v3173_v8, %s2869_s26  ;;  %879 = vrot.lane.b32.xlu1 %v3181_v16, %s2863_s0 }
 0x427   :  { %881 = vrot.lane.b32.xlu0 %v3185_v45, %s2863_s0  ;;  %823 = vrot.lane.b32.xlu1 %v3177_v5, %s2869_s26 }
 0x42b   :  { %827 = vrot.lane.b32.xlu0 %v3188_v47, %s2869_s26  ;;  %825 = vrot.lane.b32.xlu1 %v3183_v10, %s2869_s26 }
 0x42f   :  { %831 = vrot.lane.b32.xlu0 %v3185_v45, %s2869_s26  ;;  %829 = vrot.lane.b32.xlu1 %v3181_v16, %s2869_s26 }
 0x433   :  { %974 = vbcast.lane.b32.xlu0 %v968_v39, 264  ;;  %970 = vbcast.lane.b32.xlu1 %v968_v39, 256 }
 0x437   :  { %985 = vbcast.lane.b32.xlu0 %v979_v29, 264  ;;  %981 = vbcast.lane.b32.xlu1 %v979_v29, 256 }
 0x43b   :  { %996 = vbcast.lane.b32.xlu0 %v990_v35, 264  ;;  %992 = vbcast.lane.b32.xlu1 %v990_v35, 256 }
 0x43f   :  { %1007 = vbcast.lane.b32.xlu0 %v1001_v25, 264  ;;  %1003 = vbcast.lane.b32.xlu1 %v1001_v25, 256 }
 0x443   :  { %1018 = vbcast.lane.b32.xlu0 %v1012_v62, 264  ;;  %1014 = vbcast.lane.b32.xlu1 %v1012_v62, 256 }
 0x447   :  { %1029 = vbcast.lane.b32.xlu0 %v1023_v43, 264  ;;  %1025 = vbcast.lane.b32.xlu1 %v1023_v43, 256 }
 0x461   :  { %v1842_v27 = vpop.permute.xlu0 %1841  ;;  %v1837_v50 = vpop.permute.xlu1 %1836 }
 0x462   :  { %v1887_v41 = vmul.f32 %v2715_v7, %v1842_v27  ;;  %v1886_v23 = vmul.f32 %v2716_v15, %v1837_v50 }
 0x464   :  { %v1906_v12 = vsel %vm184_vm0, %v1887_v41, 0.0  ;;  %v1905_v51 = vsel %vm184_vm0, %v1886_v23, 0.0  ;;  %v2723_v41 = vld [vmem:[#allocation5 + $0x48] sm:$0xff]  ;;  %v2724_v23 = vld [vmem:[#allocation5 + $0x40] sm:$0xff] }
 0x465   :  { %v1832_v33 = vpop.permute.xlu1 %1831  ;;  %v1827_v56 = vpop.permute.xlu0 %1826  ;;  %v1907_v58 = vadd.f32 %v1906_v12, %v1905_v51 }
 0x466   :  { %v1885_v13 = vmul.f32 %v2717_v42, %v1832_v33  ;;  %v1884_v38 = vmul.f32 %v2718_v52, %v1827_v56 }
 0x467   :  { %v1908_v37 = vrot.slane %v1907_v58, 4 }
 0x468   :  { %v1897_v20 = vsel %vm184_vm0, %v1885_v13, 0.0  ;;  %v1896_v54 = vsel %vm184_vm0, %v1884_v38, 0.0 }
 0x469   :  { %v1898_v1 = vadd.f32 %v1897_v20, %v1896_v54  ;;  %v1909_v19 = vadd.f32 %v1908_v37, %v1907_v58 }
 0x46a   :  { %v1862_v17 = vpop.permute.xlu0 %1861  ;;  %v1857_v32 = vpop.permute.xlu1 %1856 }
 0x46b   :  { %v1899_v48 = vrot.slane %v1898_v1, 4  ;;  %v1891_v40 = vmul.f32 %v2719_v59, %v1862_v17  ;;  %v1890_v46 = vmul.f32 %v2720_v60, %v1857_v32  ;;  %v1910_v35 = vrot.slane %v1909_v19, 2  ;;  %v2726_v32 = vld [vmem:[#allocation5 + $0x50] sm:$0xff] }
 0x46d   :  { %v1924_v24 = vsel %vm184_vm0, %v1891_v40, 0.0  ;;  %v1923_v34 = vsel %vm184_vm0, %v1890_v46, 0.0  ;;  %v1900_v4 = vadd.f32 %v1899_v48, %v1898_v1  ;;  %v1911_v51 = vadd.f32 %v1910_v35, %v1909_v19  ;;  %v2725_v1 = vld [vmem:[#allocation5 + $0x58] sm:$0xff] }
 0x46e   :  { %v1925_v44 = vadd.f32 %v1924_v24, %v1923_v34  ;;  %v1852_v22 = vpop.permute.xlu0 %1851  ;;  %v1847_v2 = vpop.permute.xlu1 %1846 }
 0x46f   :  { %v1889_v14 = vmul.f32 %v2721_v0, %v1852_v22  ;;  %v1888_v49 = vmul.f32 %v2722_v18, %v1847_v2  ;;  %v1901_v39 = vrot.slane %v1900_v4, 2  ;;  %v1912_v59 = vrot.slane %v1911_v51, 1 }
 0x470   :  { %v1926_v26 = vrot.slane %v1925_v44, 4 }
 0x471   :  { %v1915_v3 = vsel %vm184_vm0, %v1889_v14, 0.0  ;;  %v1914_v57 = vsel %vm184_vm0, %v1888_v49, 0.0  ;;  %v1902_v43 = vadd.f32 %v1901_v39, %v1900_v4  ;;  %v1913_v14 = vadd.f32 %v1912_v59, %v1911_v51 }
 0x472   :  { %v1916_v29 = vadd.f32 %v1915_v3, %v1914_v57  ;;  %v1927_v25 = vadd.f32 %v1926_v26, %v1925_v44 }
 0x473   :  { %v1903_v52 = vrot.slane %v1902_v43, 1 }
 0x474   :  { %v1917_v62 = vrot.slane %v1916_v29, 4  ;;  %v1928_v33 = vrot.slane %v1927_v25, 2 }
 0x475   :  { %v1904_v34 = vadd.f32 %v1903_v52, %v1902_v43 }
 0x476   :  { %v1918_v27 = vadd.f32 %v1917_v62, %v1916_v29  ;;  %v1872_v50 = vpop.permute.xlu0 %1871  ;;  %v1867_v7 = vpop.permute.xlu1 %1866  ;;  %v1929_v40 = vadd.f32 %v1928_v33, %v1927_v25  ;;  %v1951_v25 = vpack.c.bf16 %v1913_v14, %v1913_v14  ;;  %v760_v14 = vrot.slane %v3175_v21, 7 }
 0x477   :  { %v1893_v15 = vmul.f32 %v2723_v41, %v1872_v50  ;;  %v1892_v12 = vmul.f32 %v2724_v23, %v1867_v7  ;;  %v1950_v26 = vpack.c.bf16 %v1904_v34, %v1904_v34  ;;  %v756_v21 = vrot.slane %v3167_v63, 7 }
 0x478   :  { %v1919_v56 = vrot.slane %v1918_v27, 2  ;;  %v1930_v18 = vrot.slane %v1929_v40, 1  ;;  %v1967_v51 = vunpack.c.l.b16 %v1951_v25 }
 0x479   :  { %v1933_v42 = vsel %vm184_vm0, %v1893_v15, 0.0  ;;  %v1932_v13 = vsel %vm184_vm0, %v1892_v12, 0.0  ;;  %v1966_v50 = vunpack.c.l.b16 %v1950_v26  ;;  %v764_v26 = vrot.slane %v3183_v10, 7 }
 0x47a   :  { %v1920_v38 = vadd.f32 %v1919_v56, %v1918_v27  ;;  %v1934_v58 = vadd.f32 %v1933_v42, %v1932_v13  ;;  %v1882_v20 = vpop.permute.xlu0 %1881  ;;  %v1877_v54 = vpop.permute.xlu1 %1876  ;;  %v1931_v62 = vadd.f32 %v1930_v18, %v1929_v40  ;;  %v758_v18 = vrot.slane %v3165_v61, 7 }
 0x47b   :  { %v1895_v17 = vmul.f32 %v2725_v1, %v1882_v20  ;;  %v1894_v48 = vmul.f32 %v2726_v32, %v1877_v54  ;;  %v1972_v13 = vsel %vm1344_vm5, %v1967_v51, %v1966_v50  ;;  %v762_v61 = vrot.slane %v3173_v8, 7 }
 0x47c   :  { %v1921_v60 = vrot.slane %v1920_v38, 1  ;;  %v1935_v46 = vrot.slane %v1934_v58, 4  ;;  %v1953_v33 = vpack.c.bf16 %v1931_v62, %v1931_v62 }
 0x47d   :  { %v1942_v37 = vsel %vm184_vm0, %v1895_v17, 0.0  ;;  %v1941_v24 = vsel %vm184_vm0, %v1894_v48, 0.0 }
 0x47e   :  { %v1936_v4 = vadd.f32 %v1935_v46, %v1934_v58  ;;  %v1943_v44 = vadd.f32 %v1942_v37, %v1941_v24  ;;  %v3356_v22 = vpop.permute.xlu0 %863  ;;  %v3358_v2 = vpop.permute.xlu1 %861  ;;  %v1922_v0 = vadd.f32 %v1921_v60, %v1920_v38  ;;  %v1969_v1 = vunpack.c.l.b16 %v1953_v33 }
 0x47f   :  { %v897_v25 = vrot.slane %v3356_v22, 1  ;;  %v896_v62 = vrot.slane %v3358_v2, 1 }
 0x480   :  { %v1937_v49 = vrot.slane %v1936_v4, 2  ;;  %v1944_v19 = vrot.slane %v1943_v44, 4  ;;  %v1952_v35 = vpack.c.bf16 %v1922_v0, %v1922_v0 }
 0x482   :  { %v1938_v3 = vadd.f32 %v1937_v49, %v1936_v4  ;;  %v1945_v57 = vadd.f32 %v1944_v19, %v1943_v44  ;;  %v3360_v39 = vpop.permute.xlu0 %867  ;;  %v3362_v29 = vpop.permute.xlu1 %865  ;;  %v1968_v12 = vunpack.c.l.b16 %v1952_v35  ;;  %v757_v4 = vrot.slane %v3171_v28, 7 }
 0x483   :  { %v759_v49 = vrot.slane %v3169_v6, 7  ;;  %v761_v19 = vrot.slane %v3179_v53, 7  ;;  %v767_v6 = vrot.slane %v3185_v45, 7  ;;  %v763_v53 = vrot.slane %v3177_v5, 7 }
 0x484   :  { %v1939_v43 = vrot.slane %v1938_v3, 1  ;;  %v1946_v27 = vrot.slane %v1945_v57, 2  ;;  %v1973_v20 = vsel %vm1346_vm6, %v1968_v12, %v1972_v13  ;;  %v778_v28 = vsel %vm768_vm10, %v757_v4, %v758_v18 }
 0x485   :  { %v1974_v32 = vsel %vm1348_vm7, %v1969_v1, %v1973_v20  ;;  %v776_v35 = vsel %vm768_vm10, %v759_v49, %v760_v14  ;;  %v787_v63 = vsel %vm754_vm11, 0.0, %v778_v28  ;;  %v779_v8 = vsel %vm768_vm10, %v756_v21, %v757_v4 }
 0x486   :  { %v1940_v7 = vadd.f32 %v1939_v43, %v1938_v3  ;;  %v1947_v41 = vadd.f32 %v1946_v27, %v1945_v57  ;;  %v3364_v15 = vpop.permute.xlu0 %869  ;;  %v3366_v23 = vpop.permute.xlu1 %859  ;;  %v3409_v43 = vadd.s32 8, %v2964_v30  ;;  %v777_v45 = vsel %vm768_vm10, %v758_v18, %v759_v49 }
 0x487   :  { %v765_v5 = vrot.slane %v3188_v47, 7  ;;  %v789_v22 = vsel %vm754_vm11, 0.0, %v776_v35  ;;  %v774_v2 = vsel %vm768_vm10, %v761_v19, %v762_v61  ;;  %v899_v12 = vrot.slane %v3360_v39, 1 }
 0x488   :  { %v1954_v56 = vpack.c.bf16 %v1940_v7, %v1940_v7  ;;  %v1948_v42 = vrot.slane %v1947_v41, 1  ;;  %v772_v7 = vsel %vm768_vm10, %v763_v53, %v764_v26  ;;  %v898_v47 = vrot.slane %v3362_v29, 1 }
 0x489   :  { %v780_v51 = vsel %vm768_vm10, %v767_v6, %v756_v21  ;;  %vm858_vm13 = vcmp.eq.s32.totalorder %v3409_v43, 15  ;;  %v791_v39 = vsel %vm754_vm11, 0.0, %v774_v2  ;;  %v3446_v29 = vsel %vm754_vm11, 0.0, %v772_v7 }
 0x48a   :  { %v1949_v52 = vadd.f32 %v1948_v42, %v1947_v41  ;;  %v3369_v38 = vpop.permute.xlu0 %809  ;;  %v3371_v58 = vpop.permute.xlu1 %871  ;;  %v1970_v54 = vunpack.c.l.b16 %v1954_v56  ;;  %v766_v41 = vrot.slane %v3181_v16, 7  ;;  %v917_v56 = vsel %vm907_vm12, %v896_v62, %v897_v25 }
 0x48b   :  { %v901_v33 = vrot.slane %v3371_v58, 1  ;;  %v773_v42 = vsel %vm768_vm10, %v762_v61, %v763_v53  ;;  %v775_v16 = vsel %vm768_vm10, %v760_v14, %v761_v19  ;;  %v895_v58 = vrot.slane %v3366_v23, 1 }
 0x48c   :  { %v1955_v17 = vpack.c.bf16 %v1949_v52, %v1949_v52  ;;  %v1975_v60 = vsel %vm1350_vm8, %v1970_v54, %v1974_v32  ;;  %v3450_v13 = vsel %vm768_vm10, %v766_v41, %v767_v6  ;;  %v900_v52 = vrot.slane %v3364_v15, 1  ;;  %v3461_v32 = vld [vmem:[%s3712_s5] sm:$0xff]  ;;  %s2872_s5 = smov 32  }
 0x48d   :  { %v785_v20 = vsel %vm754_vm11, 0.0, %v780_v51  ;;  %v925_v23 = vsel %vm858_vm13, 0.0, %v917_v56  ;;  %v918_v19 = vsel %vm907_vm12, %v895_v58, %v896_v62 }
 0x48e   :  { %v1971_v48 = vunpack.c.l.b16 %v1955_v17  ;;  %v3375_v59 = vpop.permute.xlu0 %813  ;;  %v3377_v40 = vpop.permute.xlu1 %811  ;;  %v770_v17 = vsel %vm768_vm10, %v765_v5, %v766_v41  ;;  %v845_v15 = vadd.f32 %v3369_v38, %v785_v20  ;;  %v913_v14 = vsel %vm907_vm12, %v900_v52, %v901_v33 }
 0x48f   :  { %v914_v6 = vsel %vm907_vm12, %v899_v12, %v900_v52 }
 0x490   :  { %v1976_v46 = vsel %vm1352_vm9, %v1971_v48, %v1975_v60  ;;  %v3466_v48 = vrot.slane %v3461_v32, %v950_v36  ;;  %v915_v60 = vsel %vm907_vm12, %v898_v47, %v899_v12  ;;  %v916_v36 = vsel %vm907_vm12, %v897_v25, %v898_v47 }
 0x491   :  { %v1977_v37 = vpack.c.b16 %v1976_v46, %v1976_v46  ;;  %v847_v46 = vadd.f32 %v3375_v59, %v787_v63  ;;  %v927_v28 = vsel %vm858_vm13, 0.0, %v915_v60  ;;  %v936_v61 = vadd.f32 %v918_v19, %v845_v15 }
 0x492   :  { %v3381_v24 = vpop.permute.xlu0 %873  ;;  %v816_v34 = vpop.permute.xlu1 %815  ;;  %v3508_v12 = vsel %vm754_vm11, 0.0, %v770_v17 }
 0x493   :  { %2468 = vmatmul.mubr.msk.bf16.vlgmr.msra.gmra.mxu1 %vm184_vm0, %v1977_v37  ;;  %v846_v37 = vadd.f32 %v3377_v40, %v779_v8  ;;  %v848_v4 = vadd.f32 %v816_v34, %v777_v45  ;;  %v902_v18 = vrot.slane %v3381_v24, 1  ;;  %v929_v24 = vsel %vm858_vm13, 0.0, %v913_v14 }
 0x494   :  { %2483 = vmatprep.mubr.msk.bf16.mxu1 %vm2871_vm4, %v2870_v55  ;;  %v952_v41 = vadd.f32 %v3466_v48, %v936_v61 }
 0x495   :  { %v937_v35 = vadd.f32 %v925_v23, %v846_v37  ;;  %v939_v53 = vadd.f32 %v927_v28, %v848_v4  ;;  %v912_v8 = vsel %vm907_vm12, %v901_v33, %v902_v18 }
 0x496   :  { %v818_v44 = vpop.permute.xlu0 %817  ;;  %v3387_v0 = vpop.permute.xlu1 %875 }
 0x497   :  { %v849_v38 = vadd.f32 %v818_v44, %v789_v22  ;;  %v903_v59 = vrot.slane %v3387_v0, 1  ;;  %v953_v10 = vadd.f32 %v3466_v48, %v937_v35 }
 0x499   :  { %v940_v62 = vadd.f32 %v914_v6, %v849_v38  ;;  %v911_v22 = vsel %vm907_vm12, %v902_v18, %v903_v59 }
 0x49a   :  { %v3398_v3 = vpop.permute.xlu0 %877  ;;  %v820_v57 = vpop.permute.xlu1 %819  ;;  %v931_v56 = vsel %vm858_vm13, 0.0, %v911_v22 }
 0x49b   :  { %v850_v49 = vadd.f32 %v820_v57, %v775_v16  ;;  %v938_v57 = vadd.f32 %v916_v36, %v847_v46  ;;  %v904_v0 = vrot.slane %v3398_v3, 1  ;;  %v3520_v51 = vadd.f32 %v3466_v48, %v940_v62 }
 0x49d   :  { %v941_v63 = vadd.f32 %v929_v24, %v850_v49  ;;  %v3511_v47 = vadd.f32 %v3466_v48, %v938_v57 }
 0x49e   :  { %v822_v27 = vpop.permute.xlu0 %821  ;;  %v3423_v50 = vpop.permute.xlu1 %879 }
 0x49f   :  { %v851_v40 = vadd.f32 %v822_v27, %v791_v39  ;;  %v905_v44 = vrot.slane %v3423_v50, 1  ;;  %v771_v27 = vsel %vm768_vm10, %v764_v26, %v765_v5  ;;  %v3515_v26 = vadd.f32 %v3466_v48, %v939_v53 }
 0x4a0   :  { %v3523_v33 = vadd.f32 %v3466_v48, %v941_v63 }
 0x4a1   :  { %v942_v45 = vadd.f32 %v912_v8, %v851_v40  ;;  %v909_v3 = vsel %vm907_vm12, %v904_v0, %v905_v44 }
 0x4a2   :  { %v882_v54 = vpop.permute.xlu0 %881  ;;  %v824_v1 = vpop.permute.xlu1 %823  ;;  %v933_v52 = vsel %vm858_vm13, 0.0, %v909_v3 }
 0x4a3   :  { %v906_v25 = vrot.slane %v882_v54, 1  ;;  %v852_v2 = vadd.f32 %v824_v1, %v773_v42  ;;  %v3529_v42 = vsel %vm907_vm12, %v903_v59, %v904_v0  ;;  %v3532_v16 = vadd.f32 %v3466_v48, %v942_v45 }
 0x4a5   :  { %v919_v5 = vsel %vm907_vm12, %v906_v25, %v895_v58  ;;  %v3534_v39 = vadd.f32 %v931_v56, %v852_v2  ;;  %v3540_v58 = vsel %vm907_vm12, %v905_v44, %v906_v25 }
 0x4a6   :  { %v828_v34 = vpop.permute.xlu0 %827  ;;  %v3485_v21 = vpop.permute.xlu1 %825  ;;  %v3544_v17 = vsel %vm858_vm13, 0.0, %v919_v5 }
 0x4a7   :  { %v854_v1 = vadd.f32 %v828_v34, %v771_v27  ;;  %v853_v34 = vadd.f32 %v3485_v21, %v3446_v29 }
 0x4a9   :  { %v945_v44 = vadd.f32 %v933_v52, %v854_v1 }
 0x4aa   :  { %v832_v50 = vpop.permute.xlu0 %831  ;;  %v3501_v7 = vpop.permute.xlu1 %829 }
 0x4ab   :  { %v856_v35 = vadd.f32 %v832_v50, %v3450_v13  ;;  %v855_v50 = vadd.f32 %v3501_v7, %v3508_v12 }
 0x4ae   :  { %v975_v20 = vpop.permute.xlu0 %974  ;;  %v971_v54 = vpop.permute.xlu1 %970 }
 0x4af   :  { %vm1032_vm15 = vcmp.eq.s32.totalorder %v975_v20, 1  ;;  %vm1135_vm1 = vcmp.eq.s32.totalorder %v975_v20, 2  ;;  %vm1237_vm2 = vcmp.eq.s32.totalorder %v975_v20, 3  ;;  %vm1031_vm3 = vcmp.eq.s32.totalorder %v971_v54, 1 }
 0x4b0   :  { %v1068_v15 = vsel %vm1032_vm15, %v953_v10, -1e+30  ;;  %v1171_v23 = vsel %vm1135_vm1, %v953_v10, -1e+30  ;;  %v1273_v37 = vsel %vm1237_vm2, %v953_v10, -1e+30  ;;  %v3570_v20 = vadd.f32 %v3466_v48, %v3534_v39 }
 0x4b1   :  { %v1081_v60 = vsel %vm1079_vm14, %v1068_v15, -inf  ;;  %v1183_v46 = vsel %vm1079_vm14, %v1171_v23, -inf  ;;  %v1067_v4 = vsel %vm1031_vm3, %v952_v41, -1e+30  ;;  %v1285_v14 = vsel %vm1079_vm14, %v1273_v37, -inf }
 0x4b2   :  { %v1080_v36 = vsel %vm1079_vm14, %v1067_v4, -inf  ;;  %vm1134_vm10 = vcmp.eq.s32.totalorder %v971_v54, 2  ;;  %vm1236_vm11 = vcmp.eq.s32.totalorder %v971_v54, 3  ;;  %v986_v43 = vpop.permute.xlu0 %985  ;;  %v982_v19 = vpop.permute.xlu1 %981  ;;  %v944_v23 = vadd.f32 %v3529_v42, %v853_v34 }
 0x4b3   :  { %v1082_v18 = vmax.f32 %v1080_v36, %v1081_v60  ;;  %v1170_v38 = vsel %vm1134_vm10, %v952_v41, -1e+30  ;;  %v1272_v49 = vsel %vm1236_vm11, %v952_v41, -1e+30  ;;  %vm1034_vm12 = vcmp.eq.s32.totalorder %v986_v43, 1 }
 0x4b4   :  { %v1182_v28 = vsel %vm1079_vm14, %v1170_v38, -inf  ;;  %v1284_v59 = vsel %vm1079_vm14, %v1272_v49, -inf  ;;  %v1070_v40 = vsel %vm1034_vm12, %v3515_v26, -1e+30  ;;  %vm1137_vm13 = vcmp.eq.s32.totalorder %v986_v43, 2 }
 0x4b5   :  { %v1083_v61 = vrot.slane %v1082_v18, 4  ;;  %v1184_v6 = vmax.f32 %v1182_v28, %v1183_v46  ;;  %v1286_v24 = vmax.f32 %v1284_v59, %v1285_v14  ;;  %v1173_v57 = vsel %vm1137_vm13, %v3515_v26, -1e+30 }
 0x4b6   :  { %vm1033_vm15 = vcmp.eq.s32.totalorder %v982_v19, 1  ;;  %vm1136_vm1 = vcmp.eq.s32.totalorder %v982_v19, 2  ;;  %v997_v0 = vpop.permute.xlu0 %996  ;;  %v1090_v63 = vsel %vm1079_vm14, %v1070_v40, -inf  ;;  %vm1239_vm2 = vcmp.eq.s32.totalorder %v986_v43, 3  ;;  %v993_v39 = vpop.permute.xlu1 %992 }
 0x4b7   :  { %v1084_v53 = vmax.f32 %v1082_v18, %v1083_v61  ;;  %v1185_v25 = vrot.slane %v1184_v6, 4  ;;  %v1287_v62 = vrot.slane %v1286_v24, 4  ;;  %v1069_v8 = vsel %vm1033_vm15, %v3511_v47, -1e+30 }
 0x4b8   :  { %v1172_v29 = vsel %vm1136_vm1, %v3511_v47, -1e+30  ;;  %v1192_v2 = vsel %vm1079_vm14, %v1173_v57, -inf  ;;  %v1089_v27 = vsel %vm1079_vm14, %v1069_v8, -inf  ;;  %vm1238_vm3 = vcmp.eq.s32.totalorder %v982_v19, 3 }
 0x4b9   :  { %v1085_v21 = vrot.slane %v1084_v53, 2  ;;  %v1186_v45 = vmax.f32 %v1184_v6, %v1185_v25  ;;  %v1288_v22 = vmax.f32 %v1286_v24, %v1287_v62  ;;  %v1191_v13 = vsel %vm1079_vm14, %v1172_v29, -inf }
 0x4ba   :  { %vm1036_vm10 = vcmp.eq.s32.totalorder %v997_v0, 1  ;;  %v1275_v3 = vsel %vm1239_vm2, %v3515_v26, -1e+30  ;;  %v1091_v10 = vmax.f32 %v1089_v27, %v1090_v63  ;;  %v1193_v5 = vmax.f32 %v1191_v13, %v1192_v2  ;;  %v1008_v6 = vpop.permute.xlu0 %1007  ;;  %v1004_v13 = vpop.permute.xlu1 %1003 }
 0x4bb   :  { %v1187_v41 = vrot.slane %v1186_v45, 2  ;;  %v1274_v56 = vsel %vm1238_vm3, %v3511_v47, -1e+30  ;;  %v1072_v52 = vsel %vm1036_vm10, %v3523_v33, -1e+30  ;;  %vm1139_vm11 = vcmp.eq.s32.totalorder %v997_v0, 2 }
 0x4bc   :  { %v1086_v54 = vmax.f32 %v1084_v53, %v1085_v21  ;;  %v1289_v1 = vrot.slane %v1288_v22, 2  ;;  %v1092_v15 = vrot.slane %v1091_v10, 4  ;;  %v1294_v7 = vsel %vm1079_vm14, %v1275_v3, -inf }
 0x4bd   :  { %v1194_v12 = vrot.slane %v1193_v5, 4  ;;  %v1293_v26 = vsel %vm1079_vm14, %v1274_v56, -inf  ;;  %v3576_v60 = vadd.f32 %v3466_v48, %v945_v44  ;;  %v947_v47 = vadd.f32 %v3544_v17, %v856_v35 }
 0x4be   :  { %v1093_v46 = vmax.f32 %v1091_v10, %v1092_v15  ;;  %v1175_v37 = vsel %vm1139_vm11, %v3523_v33, -1e+30  ;;  %v946_v4 = vadd.f32 %v3540_v58, %v855_v50  ;;  %v1188_v14 = vmax.f32 %v1186_v45, %v1187_v41 }
 0x4bf   :  { %v1195_v36 = vmax.f32 %v1193_v5, %v1194_v12  ;;  %vm1241_vm12 = vcmp.eq.s32.totalorder %v997_v0, 3  ;;  %v1087_v42 = vrot.slane %v1086_v54, 1  ;;  %v1290_v43 = vmax.f32 %v1288_v22, %v1289_v1  ;;  %v1019_v12 = vpop.permute.xlu0 %1018 }
 0x4c0   :  { %v1295_v18 = vmax.f32 %v1293_v26, %v1294_v7  ;;  %v1277_v38 = vsel %vm1241_vm12, %v3523_v33, -1e+30  ;;  %v1094_v49 = vrot.slane %v1093_v46, 2  ;;  %v1099_v19 = vsel %vm1079_vm14, %v1072_v52, -inf }
 0x4c1   :  { %v1201_v28 = vsel %vm1079_vm14, %v1175_v37, -inf  ;;  %vm1035_vm13 = vcmp.eq.s32.totalorder %v993_v39, 1  ;;  %v1196_v17 = vrot.slane %v1195_v36, 2  ;;  %vm1138_vm15 = vcmp.eq.s32.totalorder %v993_v39, 2 }
 0x4c2   :  { %v1071_v59 = vsel %vm1035_vm13, %v3520_v51, -1e+30  ;;  %vm1240_vm1 = vcmp.eq.s32.totalorder %v993_v39, 3  ;;  %v1189_v58 = vrot.slane %v1188_v14, 1  ;;  %v1303_v40 = vsel %vm1079_vm14, %v1277_v38, -inf }
 0x4c3   :  { %v1098_v34 = vsel %vm1079_vm14, %v1071_v59, -inf  ;;  %v1174_v61 = vsel %vm1138_vm15, %v3520_v51, -1e+30  ;;  %v1296_v33 = vrot.slane %v1295_v18, 4  ;;  %v1276_v57 = vsel %vm1240_vm1, %v3520_v51, -1e+30 }
 0x4c4   :  { %v1100_v24 = vmax.f32 %v1098_v34, %v1099_v19  ;;  %v1200_v44 = vsel %vm1079_vm14, %v1174_v61, -inf  ;;  %v1291_v35 = vrot.slane %v1290_v43, 1  ;;  %v1095_v53 = vmax.f32 %v1093_v46, %v1094_v49 }
 0x4c5   :  { %v1202_v25 = vmax.f32 %v1200_v44, %v1201_v28  ;;  %v1302_v62 = vsel %vm1079_vm14, %v1276_v57, -inf  ;;  %v1197_v0 = vmax.f32 %v1195_v36, %v1196_v17  ;;  %vm1038_vm2 = vcmp.eq.s32.totalorder %v1008_v6, 1 }
 0x4c6   :  { %v1101_v63 = vrot.slane %v1100_v24, 4  ;;  %v1304_v8 = vmax.f32 %v1302_v62, %v1303_v40  ;;  %v3592_v29 = vadd.f32 %v3466_v48, %v944_v23  ;;  %v3595_v21 = vadd.f32 %v3466_v48, %v947_v47  ;;  %v1030_v62 = vpop.permute.xlu0 %1029 }
 0x4c7   :  { %v1203_v45 = vrot.slane %v1202_v25, 4  ;;  %v1074_v22 = vsel %vm1038_vm2, %v3570_v20, -1e+30  ;;  %v3599_v51 = vadd.f32 %v3466_v48, %v946_v4  ;;  %v3601_v2 = vmax.f32 %v1086_v54, %v1087_v42 }
 0x4c8   :  { %v1297_v27 = vmax.f32 %v1295_v18, %v1296_v33  ;;  %vm1141_vm3 = vcmp.eq.s32.totalorder %v1008_v6, 2  ;;  %v3603_v50 = vmax.f32 %v1188_v14, %v1189_v58  ;;  %v1102_v41 = vmax.f32 %v1100_v24, %v1101_v63  ;;  %v1015_v58 = vpop.permute.xlu1 %1014 }
 0x4c9   :  { %v1177_v3 = vsel %vm1141_vm3, %v3570_v20, -1e+30  ;;  %vm1243_vm10 = vcmp.eq.s32.totalorder %v1008_v6, 3  ;;  %v3606_v10 = vmax.f32 %v1290_v43, %v1291_v35  ;;  %v1096_v5 = vrot.slane %v1095_v53, 1 }
 0x4ca   :  { %v1198_v56 = vrot.slane %v1197_v0, 1  ;;  %v1305_v52 = vrot.slane %v1304_v8, 4  ;;  %v1204_v1 = vmax.f32 %v1202_v25, %v1203_v45  ;;  %v1108_v48 = vsel %vm1079_vm14, %v1074_v22, -inf }
 0x4cb   :  { %v1279_v54 = vsel %vm1243_vm10, %v3570_v20, -1e+30  ;;  %vm1037_vm11 = vcmp.eq.s32.totalorder %v1004_v13, 1  ;;  %v1298_v15 = vrot.slane %v1297_v27, 2  ;;  %v1210_v23 = vsel %vm1079_vm14, %v1177_v3, -inf }
 0x4cc   :  { %v1073_v7 = vsel %vm1037_vm11, %v3532_v16, -1e+30  ;;  %vm1140_vm12 = vcmp.eq.s32.totalorder %v1004_v13, 2  ;;  %v1103_v26 = vrot.slane %v1102_v41, 2  ;;  %vm1242_vm13 = vcmp.eq.s32.totalorder %v1004_v13, 3 }
 0x4cd   :  { %v1107_v47 = vsel %vm1079_vm14, %v1073_v7, -inf  ;;  %v1176_v46 = vsel %vm1140_vm12, %v3532_v16, -1e+30  ;;  %v1306_v37 = vmax.f32 %v1304_v8, %v1305_v52  ;;  %v1312_v39 = vsel %vm1079_vm14, %v1279_v54, -inf  ;;  %v1026_v7 = vpop.permute.xlu1 %1025 }
 0x4ce   :  { %v1109_v4 = vmax.f32 %v1107_v47, %v1108_v48  ;;  %v1209_v20 = vsel %vm1079_vm14, %v1176_v46, -inf  ;;  %v1205_v14 = vrot.slane %v1204_v1, 2  ;;  %v1278_v42 = vsel %vm1242_vm13, %v3532_v16, -1e+30 }
 0x4cf   :  { %v1211_v36 = vmax.f32 %v1209_v20, %v1210_v23  ;;  %vm1040_vm15 = vcmp.eq.s32.totalorder %v1019_v12, 1  ;;  %v3617_v43 = vmax.f32 %v1095_v53, %v1096_v5  ;;  %v3619_v18 = vmax.f32 %v1197_v0, %v1198_v56 }
 0x4d0   :  { %v1110_v38 = vrot.slane %v1109_v4, 4  ;;  %v1311_v49 = vsel %vm1079_vm14, %v1278_v42, -inf  ;;  %v3622_v19 = vmax.f32 %v1297_v27, %v1298_v15  ;;  %v1076_v59 = vsel %vm1040_vm15, %v3576_v60, -1e+30 }
 0x4d1   :  { %v1212_v28 = vrot.slane %v1211_v36, 4  ;;  %v1313_v17 = vmax.f32 %v1311_v49, %v1312_v39  ;;  %v3625_v40 = vmax.f32 %v1102_v41, %v1103_v26  ;;  %vm1143_vm1 = vcmp.eq.s32.totalorder %v1019_v12, 2 }
 0x4d2   :  { %v1111_v34 = vmax.f32 %v1109_v4, %v1110_v38  ;;  %vm1245_vm2 = vcmp.eq.s32.totalorder %v1019_v12, 3  ;;  %v3627_v16 = vmax.f32 %v1204_v1, %v1205_v14  ;;  %v1307_v61 = vrot.slane %v1306_v37, 2 }
 0x4d3   :  { %v1314_v6 = vrot.slane %v1313_v17, 4  ;;  %v1179_v33 = vsel %vm1143_vm1, %v3576_v60, -1e+30  ;;  %v1213_v24 = vmax.f32 %v1211_v36, %v1212_v28  ;;  %v1117_v44 = vsel %vm1079_vm14, %v1076_v59, -inf }
 0x4d4   :  { %v1281_v57 = vsel %vm1245_vm2, %v3576_v60, -1e+30  ;;  %vm1039_vm3 = vcmp.eq.s32.totalorder %v1015_v58, 1  ;;  %v1112_v35 = vrot.slane %v1111_v34, 2  ;;  %v1219_v53 = vsel %vm1079_vm14, %v1179_v33, -inf }
 0x4d5   :  { %v1075_v25 = vsel %vm1039_vm3, %v3592_v29, -1e+30  ;;  %vm1142_vm10 = vcmp.eq.s32.totalorder %v1015_v58, 2  ;;  %v1315_v0 = vmax.f32 %v1313_v17, %v1314_v6  ;;  %vm1244_vm11 = vcmp.eq.s32.totalorder %v1015_v58, 3 }
 0x4d6   :  { %v1116_v63 = vsel %vm1079_vm14, %v1075_v25, -inf  ;;  %v1178_v8 = vsel %vm1142_vm10, %v3592_v29, -1e+30  ;;  %v1105_v45 = vrot.slane %v3625_v40, 1  ;;  %v1321_v22 = vsel %vm1079_vm14, %v1281_v57, -inf }
 0x4d7   :  { %v1118_v27 = vmax.f32 %v1116_v63, %v1117_v44  ;;  %v1218_v60 = vsel %vm1079_vm14, %v1178_v8, -inf  ;;  %v3639_v13 = vmax.f32 %v1306_v37, %v1307_v61  ;;  %v1280_v3 = vsel %vm1244_vm11, %v3592_v29, -1e+30 }
 0x4d8   :  { %v1220_v41 = vmax.f32 %v1218_v60, %v1219_v53  ;;  %vm1042_vm12 = vcmp.eq.s32.totalorder %v1030_v62, 1  ;;  %v1113_v5 = vmax.f32 %v1111_v34, %v1112_v35  ;;  %v1214_v56 = vrot.slane %v1213_v24, 2 }
 0x4d9   :  { %v1119_v52 = vrot.slane %v1118_v27, 4  ;;  %v1320_v1 = vsel %vm1079_vm14, %v1280_v3, -inf  ;;  %v1316_v48 = vrot.slane %v1315_v0, 2  ;;  %v1078_v23 = vsel %vm1042_vm12, %v3595_v21, -1e+30 }
 0x4da   :  { %v1221_v54 = vrot.slane %v1220_v41, 4  ;;  %v1322_v15 = vmax.f32 %v1320_v1, %v1321_v22  ;;  %v1126_v26 = vsel %vm1079_vm14, %v1078_v23, -inf  ;;  %vm1145_vm13 = vcmp.eq.s32.totalorder %v1030_v62, 2 }
 0x4db   :  { %v1120_v12 = vmax.f32 %v1118_v27, %v1119_v52  ;;  %vm1247_vm15 = vcmp.eq.s32.totalorder %v1030_v62, 3  ;;  %v1181_v29 = vsel %vm1145_vm13, %v3595_v21, -1e+30  ;;  %vm1041_vm1 = vcmp.eq.s32.totalorder %v1026_v7, 1 }
 0x4dc   :  { %v1222_v47 = vmax.f32 %v1220_v41, %v1221_v54  ;;  %v1323_v46 = vrot.slane %v1322_v15, 4  ;;  %v1283_v37 = vsel %vm1247_vm15, %v3595_v21, -1e+30  ;;  %v1228_v4 = vsel %vm1079_vm14, %v1181_v29, -inf }
 0x4dd   :  { %v1121_v39 = vrot.slane %v1120_v12, 2  ;;  %v1330_v20 = vsel %vm1079_vm14, %v1283_v37, -inf  ;;  %v1077_v42 = vsel %vm1041_vm1, %v3599_v51, -1e+30  ;;  %vm1144_vm2 = vcmp.eq.s32.totalorder %v1026_v7, 2 }
 0x4de   :  { %v1223_v14 = vrot.slane %v1222_v47, 2  ;;  %v1324_v36 = vmax.f32 %v1322_v15, %v1323_v46  ;;  %v1125_v49 = vsel %vm1079_vm14, %v1077_v42, -inf  ;;  %v1180_v28 = vsel %vm1144_vm2, %v3599_v51, -1e+30 }
 0x4df   :  { %v1122_v38 = vmax.f32 %v1120_v12, %v1121_v39  ;;  %vm1246_vm3 = vcmp.eq.s32.totalorder %v1026_v7, 3  ;;  %v1127_v59 = vmax.f32 %v1125_v49, %v1126_v26  ;;  %v1227_v21 = vsel %vm1079_vm14, %v1180_v28, -inf  ;;  %v2545_v26 = vld [vmem:[#allocation10 + $0x70] sm:$0xff]  }
 0x4e0   :  { %v1325_v17 = vrot.slane %v1324_v36, 2  ;;  %v1282_v58 = vsel %vm1246_vm3, %v3599_v51, -1e+30  ;;  %v1215_v34 = vmax.f32 %v1213_v24, %v1214_v56  ;;  %v1317_v61 = vmax.f32 %v1315_v0, %v1316_v48  ;;  %v2544_v56 = vld [vmem:[#allocation10 + $0x78] sm:$0xff]  }
 0x4e1   :  { %v1229_v6 = vmax.f32 %v1227_v21, %v1228_v4  ;;  %v1329_v33 = vsel %vm1079_vm14, %v1282_v58, -inf  ;;  %v1300_v44 = vrot.slane %v3622_v19, 1  ;;  %v1114_v57 = vrot.slane %v1113_v5, 1  ;;  %2472 = vmatpush3.bf16.msra.mxu0 %v2544_v56 }
 0x4e2   :  { %v1128_v35 = vrot.slane %v1127_v59, 4  ;;  %v1331_v53 = vmax.f32 %v1329_v33, %v1330_v20  ;;  %v1123_v25 = vrot.slane %v1122_v38, 1  ;;  %v1326_v63 = vmax.f32 %v1324_v36, %v1325_v17  ;;  %2473 = vmatprep.subr.bf16.mxu0 %v2870_v55 }
 0x4e3   :  { %v1230_v62 = vrot.slane %v1229_v6, 4  ;;  %v1224_v8 = vmax.f32 %v1222_v47, %v1223_v14  ;;  %v1207_v22 = vrot.slane %v3627_v16, 1  ;;  %v1309_v27 = vrot.slane %v3639_v13, 1 }
 0x4e4   :  { %v1129_v60 = vmax.f32 %v1127_v59, %v1128_v35  ;;  %v1332_v51 = vrot.slane %v1331_v53, 4  ;;  %v1106_v24 = vmax.f32 %v3625_v40, %v1105_v45  ;;  %v1216_v0 = vrot.slane %v1215_v34, 1 }
 0x4e5   :  { %v1231_v41 = vmax.f32 %v1229_v6, %v1230_v62  ;;  %v1318_v3 = vrot.slane %v1317_v61, 1  ;;  %v1115_v52 = vmax.f32 %v1113_v5, %v1114_v57  ;;  %v1225_v54 = vrot.slane %v1224_v8, 1  ;;  %2474 = vmatpush3.bf16.msra.mxu0 %v2545_v26 }
 0x4e6   :  { %v1130_v1 = vrot.slane %v1129_v60, 2  ;;  %v1333_v48 = vmax.f32 %v1331_v53, %v1332_v51  ;;  %v1301_v15 = vmax.f32 %v3622_v19, %v1300_v44  ;;  %v1327_v23 = vrot.slane %v1326_v63, 1  ;;  %2475 = vmatprep.subr.bf16.mxu0 %v2870_v55  ;;  %v2551_v51 = vld [vmem:[#allocation10 + $0x88] sm:$0xff]  }
 0x4e7   :  { %v1232_v7 = vrot.slane %v1231_v41, 2  ;;  %v1124_v12 = vmax.f32 %v1122_v38, %v1123_v25  ;;  %v1208_v47 = vmax.f32 %v3627_v16, %v1207_v22  ;;  %v1310_v46 = vmax.f32 %v3639_v13, %v1309_v27  ;;  %v2547_v22 = vld [vmem:[#allocation10 + $0xa8] sm:$0xff]   ;;  %v2548_v27 = vld [vmem:[#allocation10 + $0xa0] sm:$0xff]  }
 0x4e8   :  { %v1334_v40 = vrot.slane %v1333_v48, 2  ;;  %v1345_v45 = vsel %vm1344_vm5, %v3617_v43, %v3601_v2  ;;  %v1319_v5 = vmax.f32 %v1317_v61, %v1318_v3  ;;  %v1217_v29 = vmax.f32 %v1215_v34, %v1216_v0  ;;  %v2546_v43 = vld [vmem:[#allocation10 + $0x68] sm:$0xff]  }
 0x4e9   :  { %v1233_v37 = vmax.f32 %v1231_v41, %v1232_v7  ;;  %v1347_v19 = vsel %vm1346_vm6, %v1106_v24, %v1345_v45  ;;  %v1226_v4 = vmax.f32 %v1224_v8, %v1225_v54  ;;  %v1131_v14 = vmax.f32 %v1129_v60, %v1130_v1  ;;  %2476 = vmatpush3.bf16.msra.mxu0 %v2546_v43  ;;  %v2550_v60 = vld [vmem:[#allocation10 + $0x90] sm:$0xff]  }
 0x4ea   :  { %v1335_v39 = vmax.f32 %v1333_v48, %v1334_v40  ;;  %v1349_v20 = vsel %vm1348_vm7, %v1115_v52, %v1347_v19  ;;  %v1328_v16 = vmax.f32 %v1326_v63, %v1327_v23  ;;  %v1361_v13 = vsel %vm1344_vm5, %v3619_v18, %v3603_v50  ;;  %2487 = vmatprep.subr.bf16.mxu0 %v2870_v55 }
 0x4eb   :  { %v1234_v36 = vrot.slane %v1233_v37, 1  ;;  %v1351_v2 = vsel %vm1350_vm8, %v1124_v12, %v1349_v20  ;;  %v1375_v38 = vsel %vm1344_vm5, %v1301_v15, %v3606_v10  ;;  %v1362_v49 = vsel %vm1346_vm6, %v1208_v47, %v1361_v13 }
 0x4ec   :  { %v1336_v42 = vrot.slane %v1335_v39, 1  ;;  %v1132_v28 = vrot.slane %v1131_v14, 1  ;;  %v1376_v17 = vsel %vm1346_vm6, %v1310_v46, %v1375_v38  ;;  %v1363_v21 = vsel %vm1348_vm7, %v1217_v29, %v1362_v49 }
 0x4ed   :  { %v1235_v59 = vmax.f32 %v1233_v37, %v1234_v36  ;;  %v1377_v50 = vsel %vm1348_vm7, %v1319_v5, %v1376_v17  ;;  %v1364_v18 = vsel %vm1350_vm8, %v1226_v4, %v1363_v21  ;;  %v1959_v44 = vrot.slane %v3461_v32, %v1000_v11  ;;  %v2549_v11 = vld [vmem:[#allocation10 + $0x98] sm:$0xff]   ;;  %v2552_v5 = vld [vmem:[#allocation10 + $0x80] sm:$0xff]  }
 0x4ee   :  { %v1337_v58 = vmax.f32 %v1335_v39, %v1336_v42  ;;  %v1133_v34 = vmax.f32 %v1131_v14, %v1132_v28  ;;  %v1378_v61 = vsel %vm1350_vm8, %v1328_v16, %v1377_v50  ;;  %v2044_v24 = vrot.slane %v3461_v32, %v1011_v31  ;;  %v2113_v31 = vld [vmem:[#allocation8] sm:$0xff] }
 0x4ef   :  { %v1365_v10 = vsel %vm1352_vm9, %v1235_v59, %v1364_v18  ;;  %v2114_v45 = vpack.c.bf16 %v2113_v31, %v2113_v31  ;;  %vm2116_vm5 = vcmask 48128   ;;  %vm2205_vm6 = vcmask 785408  }
 0x4f0   :  { %v1379_v6 = vsel %vm1352_vm9, %v1337_v58, %v1378_v61  ;;  %1366 = vrot.lane.b32.xlu1 %v1365_v10, %s2872_s5  ;;  %v1353_v33 = vsel %vm1352_vm9, %v1133_v34, %v1351_v2  ;;  %v2168_v20 = vrot.slane %v3461_v32, %v1022_v9 }
 0x4f1   :  { %1380 = vrot.lane.b32.xlu0 %v1379_v6, %s2863_s0 }
 0x553   :  { %v2033_v57 = vpop.f32.mrf.mxu1 }
 0x554   :  { %v2034_v35 = vadd.f32 %v2033_v57, %v1959_v44 }
 0x555   :  { %v2469_v53 = vpop.f32.mrf.mxu1 }
 0x556   :  { %2709 = vtanh.f32 %v2034_v35 }
 0x557   :  { %v2036_v25 = vpop.f32.mrf.mxu1 }
 0x559   :  { %v2470_v62 = vpop.f32.mrf.mxu1 }
 0x562   :  { %v1367_v15 = vpop.permute.xlu1 %1366 }
 0x563   :  { %v2710_v63 = vpop.eup %2709  ;;  %v1381_v23 = vpop.permute.xlu0 %1380  ;;  %v1383_v7 = vsel %vm1079_vm14, %v1353_v33, %v1367_v15 }
 0x564   :  { %v2040_v8 = vpack.c.bf16 %v2710_v63, %v2710_v63 }
 0x566   :  { %2478 = vmatmul.mubr.msk.bf16.vlgmr.msra.gmra.mxu0 %vm184_vm0, %v2040_v8  ;;  %vm1384_vm0 = vcmask 523264  }
 0x567   :  { %2499 = vmatprep.mubr.msk.bf16.mxu0 %vm2871_vm4, %v2870_v55  ;;  %2488 = vmatpush3.bf16.msra.mxu0 %v2547_v22  ;;  %vm2120_vm4 = vcmask 1042432  }
 0x568   :  { %2489 = vmatprep.subr.bf16.mxu0 %v2870_v55 }
 0x56b   :  { %2490 = vmatpush3.bf16.msra.mxu0 %v2548_v27 }
 0x56c   :  { %2491 = vmatprep.subr.bf16.mxu0 %v2870_v55 }
 0x56f   :  { %2492 = vmatpush3.bf16.msra.mxu0 %v2549_v11 }
 0x570   :  { %2493 = vmatprep.subr.bf16.mxu0 %v2870_v55 }
 0x573   :  { %2494 = vmatpush3.bf16.msra.mxu0 %v2550_v60 }
 0x574   :  { %2495 = vmatprep.subr.bf16.mxu0 %v2870_v55 }
 0x577   :  { %2496 = vmatpush3.bf16.msra.mxu0 %v2551_v51 }
 0x578   :  { %2497 = vmatprep.subr.bf16.mxu0 %v2870_v55  ;;  %v1385_v55 = vsel %vm1384_vm0, %v1383_v7, %v1381_v23 }
 0x579   :  { %v1386_v12 = vmax.f32 %v1385_v55, 0.0 }
 0x57b   :  { %2498 = vmatpush3.bf16.msra.mxu0 %v2552_v5 }
 0x626   :  { %v2100_v0 = vpop.f32.mrf.mxu0 }
 0x627   :  { %v2101_v41 = vadd.f32 %v2100_v0, %v2044_v24 }
 0x628   :  { %v2479_v3 = vpop.f32.mrf.mxu0 }
 0x629   :  { %v2333_v56 = vmul.f32 -1.442695, %v2101_v41 }
 0x62a   :  { %v2103_v52 = vpop.f32.mrf.mxu0 }
 0x62b   :  { %2711 = vpow2.f32 %v2333_v56 }
 0x62c   :  { %v2480_v1 = vpop.f32.mrf.mxu0 }
 0x638   :  { %v2712_v48 = vpop.eup %2711 }
 0x639   :  { %v2109_v54 = vadd.f32 1.0, %v2712_v48 }
 0x63b   :  { %2713 = vrcp.f32 %v2109_v54 }
 0x648   :  { %v2714_v26 = vpop.eup %2713 }
 0x649   :  { %v2112_v47 = vmul.f32 %v2714_v26, %v1386_v12 }
 0x64b   :  { %v2115_v46 = vpack.c.bf16 %v2112_v47, %v2112_v47 }
 0x64d   :  { %v2122_v40 = vsel %vm2120_vm4, %v2115_v46, 0 }
 0x64e   :  { %2482 = vmatpush3.bf16.msra.mxu1 %v2122_v40 }
 0x651   :  { %2484 = vmatmul.mubr.msk.bf16.vlgmr.msra.gmra.mxu1 %vm2116_vm5, %v2114_v45 }
 0x711   :  { %v2158_v29 = vpop.f32.mrf.mxu1 }
 0x712   :  { %v2164_v37 = vpack.c.bf16 %v2158_v29, %v2158_v29 }
 0x713   :  { %v2485_v19 = vpop.f32.mrf.mxu1 }
 0x714   :  { %2500 = vmatmul.mubr.msk.bf16.vlgmr.msra.gmra.mxu0 %vm2205_vm6, %v2164_v37 }
 0x715   :  { %v2161_v39 = vpop.f32.mrf.mxu1 }
 0x717   :  { %v2486_v4 = vpop.f32.mrf.mxu1 }
 0x7d4   :  { %v2243_v14 = vpop.f32.mrf.mxu0 }
 0x7d5   :  { %v2244_v16 = vadd.f32 %v2243_v14, %v2168_v20 }
 0x7d6   :  { %v2501_v36 = vpop.f32.mrf.mxu0 }
 0x7d7   :  { %2249 = vst [vmem:[#allocation11] sm:$0xff] %v2244_v16 }
 0x7d8   :  { %v2246_v13 = vpop.f32.mrf.mxu0 }
 0x7d9   :  { %2839 = shalt.err (!%p2836_p1)
}
 0x7da   :  { %2259 = dma.vmem_to_hbm [thread:$0]  %s2257_s30, 128, %s3713_s6, [#allocation4]   ;;  %v2502_v30 = vpop.f32.mrf.mxu0 }
 0x7db   :  { %2854 = dma.done.wait [#allocation4], 128  }
 0x7dc   :  { %2855 = vsyncadd [#allocation4], 4294967168 }
 0x7dd   :  { %2263 = vsyncpa [#allocation3], 1 }
 0x7de   :  { %2264 = vsyncpa [#allocation6], 1 }
 0x7df   :  { %2265 = vsyncpa [#allocation9], 1 }
 0x7e0   :  { %2266 = vsyncpa [#allocation4], 1 }

</bundles_post_ra>
